<compile_context>
chip_gen: v5e
topology: v5e:2x2
jax: 0.10.0
libtpu: 0.0.40
codegen_flags: <defaults>
</compile_context>

<pallas_src>
import jax
import jax.numpy as jnp
from jax import lax
from jax.experimental import pallas as pl
from jax.experimental.pallas import tpu as pltpu


def _layernorm(x, g, b, eps=1e-5):
    mu = jnp.mean(x, axis=-1, keepdims=True)
    var = jnp.mean((x - mu) ** 2, axis=-1, keepdims=True)
    return (x - mu) * lax.rsqrt(var + eps) * g + b


def pool_keyquery_kernel(
    tok_ref, mask_ref,
    kqw1_ref, kqb1_ref, kqw2_ref, kqb2_ref, lng_ref, lnb_ref,
    kqw3_ref, kqb3_ref,
    slab_ref,
):
    """Mean-pool + L2-normalize + fused key/query MLPs for one batch tile."""
    H = lng_ref.shape[-1]

    tok = tok_ref[...]                                    # [TB, T, H]  bf16
    mask = mask_ref[...]                                  # [TB, T]     f32

    # ---- mean pooling on the MXU: sum_t mask[b,t] * tok[b,t,:] ----
    summed = jnp.einsum(
        'bqt,bth->bqh', mask.astype(jnp.bfloat16)[:, None, :], tok,
        preferred_element_type=jnp.float32)[:, 0, :]      # [TB, H] f32
    denom = jnp.maximum(jnp.sum(mask, axis=1, keepdims=True), 1e-9)
    text_x = summed * pl.reciprocal(denom, approx=True)

    # ---- F.normalize(p=2, dim=1), eps=1e-12  ->  x / max(||x||, 1e-12) ----
    sq = jnp.sum(text_x * text_x, axis=1, keepdims=True)
    text_x = text_x * lax.rsqrt(jnp.maximum(sq, 1e-24))

    # Hoist bias / LayerNorm parameter loads once (no per-use re-broadcast).
    b1 = kqb1_ref[...]
    b2 = kqb2_ref[...]
    b3 = kqb3_ref[...]
    gamma = lng_ref[...]
    beta = lnb_ref[...]

    def mm(x, w_ref):                                     # bf16 MXU, f32 accum
        return jnp.dot(x.astype(jnp.bfloat16), w_ref[...],
                       preferred_element_type=jnp.float32)

    relu = lambda v: jnp.maximum(v, 0.0)
    # nn.Dropout(p=0.1) layers are identity (inference semantics).

    h = relu(mm(text_x, kqw1_ref) + b1)                   # [TB, 2H] keys|query
    h = relu(mm(h, kqw2_ref) + b2)                        # [TB, 2H]
    # Shared LayerNorm (reference applies self.ln to BOTH paths), per half.
    h = jnp.concatenate(
        [_layernorm(h[:, :H], gamma, beta),
         _layernorm(h[:, H:], gamma, beta)], axis=1)      # [TB, 2H]
    kq = mm(h, kqw3_ref) + b3                             # [TB, 2H] keys|query

    # Lane-dense fused output slab: [ text_x | keys | query ].
    slab_ref[:, :H] = text_x
    slab_ref[:, H:] = kq


def clusterer_head_kernel(
    slab_ref, tw1_ref, tb1_ref, tw2_ref, tb2_ref,
    s_ref, clust_ref, trig_ref,
):
    """S = q @ k.T / sqrt(H), softmax over batch, F_hat, trigger MLP."""
    H = tb1_ref.shape[-1]
    slab = slab_ref[...]                                  # [B, 3H] f32
    text_x = slab[:, :H]
    keys = slab[:, H:2 * H]
    query = slab[:, 2 * H:]

    bf16 = jnp.bfloat16
    inv_sqrt_h = 1.0 / (float(H) ** 0.5)

    S = lax.dot_general(query.astype(bf16), keys.astype(bf16),
                        (((1,), (1,)), ((), ())),
                        preferred_element_type=jnp.float32)
    S = S * inv_sqrt_h
    s_ref[...] = S

    # sims = softmax(S, dim=1);  F_hat = sims @ F
    e = jnp.exp(S - jnp.max(S, axis=1, keepdims=True))
    sims = e * pl.reciprocal(jnp.sum(e, axis=1, keepdims=True), approx=True)
    clust = jnp.dot(sims.astype(bf16), text_x.astype(bf16),
                    preferred_element_type=jnp.float32)
    clust_ref[...] = clust

    # Trigger head.
    b1 = tb1_ref[...]
    b2 = tb2_ref[...]
    t = jnp.maximum(
        jnp.dot(clust.astype(bf16), tw1_ref[...],
                preferred_element_type=jnp.float32) + b1, 0.0)
    trig_ref[...] = jnp.dot(t.astype(bf16), tw2_ref[...],
                            preferred_element_type=jnp.float32) + b2


def sentence_model_forward(tok_emb, mask, params, *, tb=8):
    """SentenceModel forward (post-transformer part) via Pallas kernels.

    tok_emb: [B, T, H] token embeddings (stand-in for the MiniLM output)
    mask:    [B, T] float attention mask
    params:  f32 weights; nn.Linear weights stored [in, out], biases /
             LayerNorm params stored [1, H].
    Returns (clust_x, keys, query, S, text_x, trigger), matching the module.
    """
    B, T, H = tok_emb.shape
    assert H % 128 == 0, "hidden must be lane-dense (multiple of 128)"
    tb = min(tb, B)
    assert B % tb == 0
    bf16 = jnp.bfloat16

    def blockdiag(a, b):
        za = jnp.zeros_like(a)
        return jnp.concatenate(
            [jnp.concatenate([a, za], axis=1),
             jnp.concatenate([za, b], axis=1)], axis=0)

    # Fused key/query weights: one matmul per MLP layer.
    kqw1 = jnp.concatenate([params['kw1'], params['qw1']], axis=1).astype(bf16)
    kqb1 = jnp.concatenate([params['kb1'], params['qb1']], axis=1)
    kqw2 = blockdiag(params['kw2'], params['qw2']).astype(bf16)
    kqb2 = jnp.concatenate([params['kb2'], params['qb2']], axis=1)
    kqw3 = blockdiag(params['kw3'], params['qw3']).astype(bf16)
    kqb3 = jnp.concatenate([params['kb3'], params['qb3']], axis=1)
    lng, lnb = params['lng'], params['lnb']
    tw1 = params['tw1'].astype(bf16)
    tw2 = params['tw2'].astype(bf16)
    tbias1, tbias2 = params['tb1'], params['tb2']

    tok16 = tok_emb.astype(bf16)          # halve token-tile HBM traffic
    mask32 = mask.astype(jnp.float32)

    def resident(shape):                  # weights/biases stay VMEM-resident
        n = len(shape)
        return pl.BlockSpec(shape, lambda i: (0,) * n)

    # ---- kernel 1: gridded over the batch, pipelined token tiles ----
    slab = pl.pallas_call(
        pool_keyquery_kernel,
        out_shape=jax.ShapeDtypeStruct((B, 3 * H), jnp.float32),
        grid=(B // tb,),
        in_specs=[
            pl.BlockSpec((tb, T, H), lambda i: (i, 0, 0)),
            pl.BlockSpec((tb, T), lambda i: (i, 0)),
            resident((H, 2 * H)), resident((1, 2 * H)),
            resident((2 * H, 2 * H)), resident((1, 2 * H)),
            resident((1, H)), resident((1, H)),
            resident((2 * H, 2 * H)), resident((1, 2 * H)),
        ],
        out_specs=pl.BlockSpec((tb, 3 * H), lambda i: (i, 0)),
        compiler_params=pltpu.CompilerParams(
            dimension_semantics=("parallel",),
            vmem_limit_bytes=48 * 1024 * 1024),   # headroom under v7x 64 MiB
    )(tok16, mask32, kqw1, kqb1, kqw2, kqb2, lng, lnb, kqw3, kqb3)

    # ---- kernel 2: whole-batch clusterer head (S couples all rows) ----
    vmem = pl.BlockSpec(memory_space=pltpu.MemorySpace.VMEM)
    S, clust_x, trigger = pl.pallas_call(
        clusterer_head_kernel,
        out_shape=(
            jax.ShapeDtypeStruct((B, B), jnp.float32),
            jax.ShapeDtypeStruct((B, H), jnp.float32),
            jax.ShapeDtypeStruct((B, H), jnp.float32),
        ),
        in_specs=[vmem] * 5,
        out_specs=(vmem, vmem, vmem),
    )(slab, tw1, tbias1, tw2, tbias2)

    # Slice the lane-dense slab outside the kernel.
    text_x = slab[:, :H]
    keys = slab[:, H:2 * H]
    query = slab[:, 2 * H:]
    return clust_x, keys, query, S, text_x, trigger


if __name__ == "__main__":
    key = jax.random.PRNGKey(0)
    B, T, H, V = 16, 16, 128, 1000   # small shapes, but lane-dense hidden
    TB = 8                           # batch tile (grid = (B // TB,))

    ks = jax.random.split(key, 20)

    def w(k):   # nn.Linear weight stored as [in, out]
        return jax.random.normal(k, (H, H), jnp.float32) * 0.05

    def b(k):   # bias stored [1, H]
        return jax.random.normal(k, (1, H), jnp.float32) * 0.05

    params = {
        'kw1': w(ks[0]),  'kb1': b(ks[1]),
        'kw2': w(ks[2]),  'kb2': b(ks[3]),
        'kw3': w(ks[4]),  'kb3': b(ks[5]),
        'lng': jnp.ones((1, H), jnp.float32),    # LayerNorm gamma (default)
        'lnb': jnp.zeros((1, H), jnp.float32),   # LayerNorm beta
        'qw1': w(ks[6]),  'qb1': b(ks[7]),
        'qw2': w(ks[8]),  'qb2': b(ks[9]),
        'qw3': w(ks[10]), 'qb3': b(ks[11]),
        'tw1': w(ks[12]), 'tb1': b(ks[13]),
        'tw2': w(ks[14]), 'tb2': b(ks[15]),
    }

    # TODO(synk): the pretrained 'sentence-transformers/all-MiniLM-L12-v2'
    # backbone has no clean Pallas equivalent here; a deterministic embedding
    # lookup stands in for text_transformer_model(text)[0].
    emb_table = jax.random.normal(ks[16], (V, H), jnp.float32) * 0.1
    text = jax.random.randint(ks[17], (B, T), 0, V)          # token ids [B, T]
    tok_emb = emb_table[text]                                  # [B, T, H]

    lens = jax.random.randint(ks[18], (B,), 2, T + 1)
    text_mask = (jnp.arange(T)[None, :] < lens[:, None]).astype(jnp.float32)

    outs = sentence_model_forward(tok_emb, text_mask, params, tb=TB)
    jax.block_until_ready(outs)

    clust_x, keys, query, S, text_x, trigger = outs
    assert clust_x.shape == (B, H) and keys.shape == (B, H)
    assert query.shape == (B, H) and S.shape == (B, B)
    assert text_x.shape == (B, H) and trigger.shape == (B, H)
    assert all(bool(jnp.all(jnp.isfinite(o))) for o in outs)
    print("KERNEL_OK")
</pallas_src>

<mosaic_0001>
module attributes {stable_mosaic.version = 11 : i64} {
  func.func @pool_keyquery_kernel(%arg0: i32, %arg1: memref<8x16x128xbf16, #tpu.memory_space<vmem>>, %arg2: memref<8x16xf32, #tpu.memory_space<vmem>>, %arg3: memref<128x256xbf16, #tpu.memory_space<vmem>>, %arg4: memref<1x256xf32, #tpu.memory_space<vmem>>, %arg5: memref<256x256xbf16, #tpu.memory_space<vmem>>, %arg6: memref<1x256xf32, #tpu.memory_space<vmem>>, %arg7: memref<1x128xf32, #tpu.memory_space<vmem>>, %arg8: memref<1x128xf32, #tpu.memory_space<vmem>>, %arg9: memref<256x256xbf16, #tpu.memory_space<vmem>>, %arg10: memref<1x256xf32, #tpu.memory_space<vmem>>, %arg11: memref<8x384xf32, #tpu.memory_space<vmem>>) attributes {dimension_semantics = [#tpu.dimension_semantics<parallel>], iteration_bounds = array<i64: 2>, scalar_prefetch = 0 : i64, scratch_operands = 0 : i64, tpu.core_type = #tpu.core_type<tc>, window_params = [{transform_indices = @transform_0, window_bounds = array<i64: 8, 16, 128>}, {transform_indices = @transform_1, window_bounds = array<i64: 8, 16>}, {pipeline_mode = #tpu.pipeline_mode<synchronous>, transform_indices = @transform_2, window_bounds = array<i64: 128, 256>}, {pipeline_mode = #tpu.pipeline_mode<synchronous>, transform_indices = @transform_3, window_bounds = array<i64: 1, 256>}, {pipeline_mode = #tpu.pipeline_mode<synchronous>, transform_indices = @transform_4, window_bounds = array<i64: 256, 256>}, {pipeline_mode = #tpu.pipeline_mode<synchronous>, transform_indices = @transform_5, window_bounds = array<i64: 1, 256>}, {pipeline_mode = #tpu.pipeline_mode<synchronous>, transform_indices = @transform_6, window_bounds = array<i64: 1, 128>}, {pipeline_mode = #tpu.pipeline_mode<synchronous>, transform_indices = @transform_7, window_bounds = array<i64: 1, 128>}, {pipeline_mode = #tpu.pipeline_mode<synchronous>, transform_indices = @transform_8, window_bounds = array<i64: 256, 256>}, {pipeline_mode = #tpu.pipeline_mode<synchronous>, transform_indices = @transform_9, window_bounds = array<i64: 1, 256>}, {transform_indices = @transform_10, window_bounds = array<i64: 8, 384>}]} {
    %c0 = arith.constant 0 : index
    %c0_0 = arith.constant 0 : index
    %c0_1 = arith.constant 0 : index
    %0 = vector.load %arg1[%c0, %c0_0, %c0_1] : memref<8x16x128xbf16, #tpu.memory_space<vmem>>, vector<8x16x128xbf16>
    %c0_2 = arith.constant 0 : index
    %c0_3 = arith.constant 0 : index
    %1 = vector.load %arg2[%c0_2, %c0_3] : memref<8x16xf32, #tpu.memory_space<vmem>>, vector<8x16xf32>
    %2 = arith.truncf %1 : vector<8x16xf32> to vector<8x16xbf16>
    %3 = vector.shape_cast %2 : vector<8x16xbf16> to vector<8x1x16xbf16>
    "tpu.trace_start"() <{level = 10 : i32, message = "bqt,bth->bqh"}> : () -> ()
    %cst = arith.constant dense<0.000000e+00> : vector<8x1x128xf32>
    %4 = tpu.matmul %3, %0, %cst {dimension_numbers = #tpu.dot_dimension_numbers<[2], [1], [1], [2], [0, 0, 0, 1, 1, 2], [0], [0]>} : vector<8x1x16xbf16>, vector<8x16x128xbf16>, vector<8x1x128xf32> -> vector<8x1x128xf32>
    "tpu.trace_stop"() : () -> ()
    %5 = vector.shape_cast %4 : vector<8x1x128xf32> to vector<8x128xf32>
    %cst_4 = arith.constant dense<0.000000e+00> : vector<8xf32>
    %6 = vector.multi_reduction <add>, %1, %cst_4 [1] : vector<8x16xf32> to vector<8xf32>
    %7 = vector.shape_cast %6 : vector<8xf32> to vector<8x1xf32>
    %cst_5 = arith.constant 9.99999971E-10 : f32
    %8 = vector.broadcast %cst_5 : f32 to vector<8x1xf32>
    %9 = arith.maximumf %7, %8 : vector<8x1xf32>
    %10 = tpu.reciprocal %9 {approx = true} : vector<8x1xf32> -> vector<8x1xf32>
    %11 = vector.broadcast %10 : vector<8x1xf32> to vector<8x128xf32>
    %12 = arith.mulf %5, %11 : vector<8x128xf32>
    %13 = arith.mulf %12, %12 : vector<8x128xf32>
    %cst_6 = arith.constant dense<0.000000e+00> : vector<8xf32>
    %14 = vector.multi_reduction <add>, %13, %cst_6 [1] : vector<8x128xf32> to vector<8xf32>
    %15 = vector.shape_cast %14 : vector<8xf32> to vector<8x1xf32>
    %cst_7 = arith.constant 1.000000e-24 : f32
    %16 = vector.broadcast %cst_7 : f32 to vector<8x1xf32>
    %17 = arith.maximumf %15, %16 : vector<8x1xf32>
    %18 = math.rsqrt %17 : vector<8x1xf32>
    %19 = vector.broadcast %18 : vector<8x1xf32> to vector<8x128xf32>
    %20 = arith.mulf %12, %19 : vector<8x128xf32>
    %c0_8 = arith.constant 0 : index
    %c0_9 = arith.constant 0 : index
    %21 = vector.load %arg4[%c0_8, %c0_9] : memref<1x256xf32, #tpu.memory_space<vmem>>, vector<1x256xf32>
    %c0_10 = arith.constant 0 : index
    %c0_11 = arith.constant 0 : index
    %22 = vector.load %arg6[%c0_10, %c0_11] : memref<1x256xf32, #tpu.memory_space<vmem>>, vector<1x256xf32>
    %c0_12 = arith.constant 0 : index
    %c0_13 = arith.constant 0 : index
    %23 = vector.load %arg10[%c0_12, %c0_13] : memref<1x256xf32, #tpu.memory_space<vmem>>, vector<1x256xf32>
    %c0_14 = arith.constant 0 : index
    %c0_15 = arith.constant 0 : index
    %24 = vector.load %arg7[%c0_14, %c0_15] : memref<1x128xf32, #tpu.memory_space<vmem>>, vector<1x128xf32>
    %c0_16 = arith.constant 0 : index
    %c0_17 = arith.constant 0 : index
    %25 = vector.load %arg8[%c0_16, %c0_17] : memref<1x128xf32, #tpu.memory_space<vmem>>, vector<1x128xf32>
    %26 = arith.truncf %20 : vector<8x128xf32> to vector<8x128xbf16>
    %c0_18 = arith.constant 0 : index
    %c0_19 = arith.constant 0 : index
    %27 = vector.load %arg3[%c0_18, %c0_19] : memref<128x256xbf16, #tpu.memory_space<vmem>>, vector<128x256xbf16>
    %cst_20 = arith.constant dense<0.000000e+00> : vector<8x256xf32>
    %28 = tpu.matmul %26, %27, %cst_20 {dimension_numbers = #tpu.dot_dimension_numbers<[1], [0], [0], [1], [0, 0, 1, 1], [], []>} : vector<8x128xbf16>, vector<128x256xbf16>, vector<8x256xf32> -> vector<8x256xf32>
    %29 = vector.broadcast %21 : vector<1x256xf32> to vector<8x256xf32>
    %30 = arith.addf %28, %29 : vector<8x256xf32>
    %cst_21 = arith.constant 0.000000e+00 : f32
    %31 = vector.broadcast %cst_21 : f32 to vector<8x256xf32>
    %32 = arith.maximumf %30, %31 : vector<8x256xf32>
    %33 = arith.truncf %32 : vector<8x256xf32> to vector<8x256xbf16>
    %c0_22 = arith.constant 0 : index
    %c0_23 = arith.constant 0 : index
    %34 = vector.load %arg5[%c0_22, %c0_23] : memref<256x256xbf16, #tpu.memory_space<vmem>>, vector<256x256xbf16>
    %cst_24 = arith.constant dense<0.000000e+00> : vector<8x256xf32>
    %35 = tpu.matmul %33, %34, %cst_24 {dimension_numbers = #tpu.dot_dimension_numbers<[1], [0], [0], [1], [0, 0, 1, 1], [], []>} : vector<8x256xbf16>, vector<256x256xbf16>, vector<8x256xf32> -> vector<8x256xf32>
    %36 = vector.broadcast %22 : vector<1x256xf32> to vector<8x256xf32>
    %37 = arith.addf %35, %36 : vector<8x256xf32>
    %cst_25 = arith.constant 0.000000e+00 : f32
    %38 = vector.broadcast %cst_25 : f32 to vector<8x256xf32>
    %39 = arith.maximumf %37, %38 : vector<8x256xf32>
    %40 = vector.extract_strided_slice %39 {offsets = [0, 0], sizes = [8, 128], strides = [1, 1]} : vector<8x256xf32> to vector<8x128xf32>
    %cst_26 = arith.constant dense<0.000000e+00> : vector<8xf32>
    %41 = vector.multi_reduction <add>, %40, %cst_26 [1] : vector<8x128xf32> to vector<8xf32>
    %42 = vector.shape_cast %41 : vector<8xf32> to vector<8x1xf32>
    %cst_27 = arith.constant 1.280000e+02 : f32
    %43 = vector.broadcast %cst_27 : f32 to vector<8x1xf32>
    %44 = arith.divf %42, %43 : vector<8x1xf32>
    %45 = vector.broadcast %44 : vector<8x1xf32> to vector<8x128xf32>
    %46 = arith.subf %40, %45 : vector<8x128xf32>
    %47 = arith.mulf %46, %46 : vector<8x128xf32>
    %cst_28 = arith.constant dense<0.000000e+00> : vector<8xf32>
    %48 = vector.multi_reduction <add>, %47, %cst_28 [1] : vector<8x128xf32> to vector<8xf32>
    %49 = vector.shape_cast %48 : vector<8xf32> to vector<8x1xf32>
    %cst_29 = arith.constant 1.280000e+02 : f32
    %50 = vector.broadcast %cst_29 : f32 to vector<8x1xf32>
    %51 = arith.divf %49, %50 : vector<8x1xf32>
    %52 = vector.broadcast %44 : vector<8x1xf32> to vector<8x128xf32>
    %53 = arith.subf %40, %52 : vector<8x128xf32>
    %cst_30 = arith.constant 9.99999974E-6 : f32
    %54 = vector.broadcast %cst_30 : f32 to vector<8x1xf32>
    %55 = arith.addf %51, %54 : vector<8x1xf32>
    %56 = math.rsqrt %55 : vector<8x1xf32>
    %57 = vector.broadcast %56 : vector<8x1xf32> to vector<8x128xf32>
    %58 = arith.mulf %53, %57 : vector<8x128xf32>
    %59 = vector.broadcast %24 : vector<1x128xf32> to vector<8x128xf32>
    %60 = arith.mulf %58, %59 : vector<8x128xf32>
    %61 = vector.broadcast %25 : vector<1x128xf32> to vector<8x128xf32>
    %62 = arith.addf %60, %61 : vector<8x128xf32>
    %63 = vector.extract_strided_slice %39 {offsets = [0, 128], sizes = [8, 128], strides = [1, 1]} : vector<8x256xf32> to vector<8x128xf32>
    %cst_31 = arith.constant dense<0.000000e+00> : vector<8xf32>
    %64 = vector.multi_reduction <add>, %63, %cst_31 [1] : vector<8x128xf32> to vector<8xf32>
    %65 = vector.shape_cast %64 : vector<8xf32> to vector<8x1xf32>
    %cst_32 = arith.constant 1.280000e+02 : f32
    %66 = vector.broadcast %cst_32 : f32 to vector<8x1xf32>
    %67 = arith.divf %65, %66 : vector<8x1xf32>
    %68 = vector.broadcast %67 : vector<8x1xf32> to vector<8x128xf32>
    %69 = arith.subf %63, %68 : vector<8x128xf32>
    %70 = arith.mulf %69, %69 : vector<8x128xf32>
    %cst_33 = arith.constant dense<0.000000e+00> : vector<8xf32>
    %71 = vector.multi_reduction <add>, %70, %cst_33 [1] : vector<8x128xf32> to vector<8xf32>
    %72 = vector.shape_cast %71 : vector<8xf32> to vector<8x1xf32>
    %cst_34 = arith.constant 1.280000e+02 : f32
    %73 = vector.broadcast %cst_34 : f32 to vector<8x1xf32>
    %74 = arith.divf %72, %73 : vector<8x1xf32>
    %75 = vector.broadcast %67 : vector<8x1xf32> to vector<8x128xf32>
    %76 = arith.subf %63, %75 : vector<8x128xf32>
    %cst_35 = arith.constant 9.99999974E-6 : f32
    %77 = vector.broadcast %cst_35 : f32 to vector<8x1xf32>
    %78 = arith.addf %74, %77 : vector<8x1xf32>
    %79 = math.rsqrt %78 : vector<8x1xf32>
    %80 = vector.broadcast %79 : vector<8x1xf32> to vector<8x128xf32>
    %81 = arith.mulf %76, %80 : vector<8x128xf32>
    %82 = vector.broadcast %24 : vector<1x128xf32> to vector<8x128xf32>
    %83 = arith.mulf %81, %82 : vector<8x128xf32>
    %84 = vector.broadcast %25 : vector<1x128xf32> to vector<8x128xf32>
    %85 = arith.addf %83, %84 : vector<8x128xf32>
    %86 = tpu.concatenate %62, %85 in 1 : vector<8x128xf32>, vector<8x128xf32> -> vector<8x256xf32>
    %87 = arith.truncf %86 : vector<8x256xf32> to vector<8x256xbf16>
    %c0_36 = arith.constant 0 : index
    %c0_37 = arith.constant 0 : index
    %88 = vector.load %arg9[%c0_36, %c0_37] : memref<256x256xbf16, #tpu.memory_space<vmem>>, vector<256x256xbf16>
    %cst_38 = arith.constant dense<0.000000e+00> : vector<8x256xf32>
    %89 = tpu.matmul %87, %88, %cst_38 {dimension_numbers = #tpu.dot_dimension_numbers<[1], [0], [0], [1], [0, 0, 1, 1], [], []>} : vector<8x256xbf16>, vector<256x256xbf16>, vector<8x256xf32> -> vector<8x256xf32>
    %90 = vector.broadcast %23 : vector<1x256xf32> to vector<8x256xf32>
    %91 = arith.addf %89, %90 : vector<8x256xf32>
    %c0_39 = arith.constant 0 : index
    %c0_40 = arith.constant 0 : index
    %92 = vector.load %arg11[%c0_39, %c0_40] : memref<8x384xf32, #tpu.memory_space<vmem>>, vector<8x128xf32>
    tpu.vector_store %arg11[%c0_39, %c0_40], %20 {strides = array<i32>} : memref<8x384xf32, #tpu.memory_space<vmem>>, vector<8x128xf32>,
    %c0_41 = arith.constant 0 : index
    %c128 = arith.constant 128 : index
    %93 = vector.load %arg11[%c0_41, %c128] : memref<8x384xf32, #tpu.memory_space<vmem>>, vector<8x256xf32>
    tpu.vector_store %arg11[%c0_41, %c128], %91 {strides = array<i32>} : memref<8x384xf32, #tpu.memory_space<vmem>>, vector<8x256xf32>,
    return
  }
  func.func @transform_0(%arg0: i32) -> (i32, i32, i32) {
    %c0_i32 = arith.constant 0 : i32
    %c0_i32_0 = arith.constant 0 : i32
    %c0_i32_1 = arith.constant 0 : i32
    return %arg0, %c0_i32, %c0_i32_0 : i32, i32, i32
  }
  func.func @transform_1(%arg0: i32) -> (i32, i32) {
    %c0_i32 = arith.constant 0 : i32
    %c0_i32_0 = arith.constant 0 : i32
    return %arg0, %c0_i32 : i32, i32
  }
  func.func @transform_2(%arg0: i32) -> (i32, i32) {
    %c0_i32 = arith.constant 0 : i32
    %c0_i32_0 = arith.constant 0 : i32
    %c0_i32_1 = arith.constant 0 : i32
    return %c0_i32, %c0_i32_0 : i32, i32
  }
  func.func @transform_3(%arg0: i32) -> (i32, i32) {
    %c0_i32 = arith.constant 0 : i32
    %c0_i32_0 = arith.constant 0 : i32
    %c0_i32_1 = arith.constant 0 : i32
    return %c0_i32, %c0_i32_0 : i32, i32
  }
  func.func @transform_4(%arg0: i32) -> (i32, i32) {
    %c0_i32 = arith.constant 0 : i32
    %c0_i32_0 = arith.constant 0 : i32
    %c0_i32_1 = arith.constant 0 : i32
    return %c0_i32, %c0_i32_0 : i32, i32
  }
  func.func @transform_5(%arg0: i32) -> (i32, i32) {
    %c0_i32 = arith.constant 0 : i32
    %c0_i32_0 = arith.constant 0 : i32
    %c0_i32_1 = arith.constant 0 : i32
    return %c0_i32, %c0_i32_0 : i32, i32
  }
  func.func @transform_6(%arg0: i32) -> (i32, i32) {
    %c0_i32 = arith.constant 0 : i32
    %c0_i32_0 = arith.constant 0 : i32
    %c0_i32_1 = arith.constant 0 : i32
    return %c0_i32, %c0_i32_0 : i32, i32
  }
  func.func @transform_7(%arg0: i32) -> (i32, i32) {
    %c0_i32 = arith.constant 0 : i32
    %c0_i32_0 = arith.constant 0 : i32
    %c0_i32_1 = arith.constant 0 : i32
    return %c0_i32, %c0_i32_0 : i32, i32
  }
  func.func @transform_8(%arg0: i32) -> (i32, i32) {
    %c0_i32 = arith.constant 0 : i32
    %c0_i32_0 = arith.constant 0 : i32
    %c0_i32_1 = arith.constant 0 : i32
    return %c0_i32, %c0_i32_0 : i32, i32
  }
  func.func @transform_9(%arg0: i32) -> (i32, i32) {
    %c0_i32 = arith.constant 0 : i32
    %c0_i32_0 = arith.constant 0 : i32
    %c0_i32_1 = arith.constant 0 : i32
    return %c0_i32, %c0_i32_0 : i32, i32
  }
  func.func @transform_10(%arg0: i32) -> (i32, i32) {
    %c0_i32 = arith.constant 0 : i32
    %c0_i32_0 = arith.constant 0 : i32
    return %arg0, %c0_i32 : i32, i32
  }
}

</mosaic_0001>

<bundles_post_ra>
// kernel: tpu_custom_call.1
= control target key start
LH: loop header
LB: loop body
LE: loop exit
PB: predicated region body
PF: predicated region fallthrough
CT: control target
= control target key end

     0   :  { %s3083_s0 = inlined_call_operand.hbm [shape: bf16[16,16,128], index: 0, kind: input, shape index: {}]   ;;  %s3084_s1 = inlined_call_operand.hbm [shape: f32[16,16], index: 1, kind: input, shape index: {}]   ;;  %s3085_s2 = inlined_call_operand.hbm [shape: bf16[128,256], index: 2, kind: input, shape index: {}]   ;;  %s3086_s3 = inlined_call_operand.vmem [shape: f32[1,256], index: 3, kind: input, shape index: {}]   ;;  %s3087_s4 = inlined_call_operand.hbm [shape: bf16[256,256], index: 4, kind: input, shape index: {}]   ;;  %s3088_s5 = inlined_call_operand.vmem [shape: f32[1,256], index: 5, kind: input, shape index: {}]   ;;  %s3089_s6 = inlined_call_operand.hbm [shape: f32[1,128], index: 6, kind: input, shape index: {}]   ;;  %s3090_s7 = inlined_call_operand.hbm [shape: f32[1,128], index: 7, kind: input, shape index: {}]   ;;  %s3091_s8 = inlined_call_operand.hbm [shape: bf16[256,256], index: 8, kind: input, shape index: {}]   ;;  %s3092_s9 = inlined_call_operand.vmem [shape: f32[1,256], index: 9, kind: input, shape index: {}]   ;;  %s3093_s10 = inlined_call_operand.hbm [shape: f32[16,384], index: 10, kind: output, shape index: {}]  }
   0x1   :  { %3098 = sst [smem:[#allocation25_spill]] %s3083_s0 }
   0x2   :  { %3099 = sst [smem:[#allocation26_spill]] %s3085_s2 }
   0x3   :  { %3100 = sst [smem:[#allocation27_spill]] %s3087_s4 }
   0x4   :  { %3101 = sst [smem:[#allocation28_spill]] %s3089_s6 }
   0x5   :  { %3102 = sst [smem:[#allocation29_spill]] %s3090_s7 }
   0x6   :  { %3103 = sst [smem:[#allocation30_spill]] %s3091_s8 }
   0x7   :  { %15 = vsyncpa [#allocation3], 0 }
   0x8   :  { %17 = vsyncpa [#allocation3 + $0x1], 0 }
   0x9   :  { %18 = vsyncpa [#allocation6], 0 }
   0xa   :  { %20 = vsyncpa [#allocation6 + $0x1], 0 }
   0xb   :  { %21 = vsyncpa [#allocation9], 0 }
   0xc   :  { %22 = vsyncpa [#allocation12], 0 }
   0xd   :  { %23 = vsyncpa [#allocation4], 0 }
   0xe   :  { %25 = vsyncpa [#allocation4 + $0x1], 0  ;;  %s2716_s13 = smov 0   ;;  %s2718_s14 = smov 0  }
   0xf   :  { %s2720_s15 = smov 0   ;;  %s2722_s16 = smov 0  }
  0x10 LB: > { %3104 = sst [smem:[#allocation21_spill]] %s2645_s15  ;;  %s2740_s20 = sadd.s32 4294967295, %s2649_s16   ;;  %s2649_s16 = sphi %s2722_s16, %s3123_s16   ;;  %s2645_s15 = sphi %s2720_s15, %s3125_s15   ;;  %s2641_s14 = sphi %s2718_s14, %s3127_s14   ;;  %s2637_s13 = sphi %s2716_s13, %s3126_s13  }
  0x11   : > { %s3105_s2 = sld [smem:[#allocation26_spill]]  ;;  %p1758_p0 = scmp.ge.s32.totalorder %s2649_s16, 1 }
  0x12   : > { %p52_p1 = scmp.eq.s32.totalorder %s2740_s20, 0  ;;  %p282_p2 = scmp.lt.s32.totalorder %s2649_s16, 3 }
  0x13   : > { %s2651_s22 = smov [#allocation7]   ;;  %s3107_s4 = sld [smem:[#allocation27_spill]] }
  0x14   : > { %p2745_p3 = pnand %p1758_p0, %p282_p2  ;;  %s295_s23 = sshll.u32 %s2651_s22, 4  ;;  %s296_s23 = int_to_ptr.vmem [resolvable:$true] %s295_s23 }
  0x15   : > { %s3109_s7 = sld [smem:[#allocation29_spill]]  ;;  %s2652_s11 = smov [#allocation8]  }
  0x16   : > { %p2264_p4 = pneg %p2745_p3  ;;  %s312_s12 = sshll.u32 %s2652_s11, 4  ;;  %s313_s12 = int_to_ptr.vmem [resolvable:$true] %s312_s12 }
  0x17   : > { %s293_s19 = sshll.u32 %s3105_s2, 4  ;;  %s2653_s17 = smov 128   ;;  %s294_s19 = int_to_ptr.hbm [resolvable:$true] %s293_s19 }
  0x18   : > { %p2757_p6 = pnand %p2264_p4, %p52_p1  ;;  %s2654_s18 = smov 8  }
  0x19   : > { %s310_s26 = sshll.u32 %s3107_s4, 4  ;;  %s3110_s6 = sld [smem:[#allocation28_spill]]  ;;  %s311_s26 = int_to_ptr.hbm [resolvable:$true] %s310_s26 }
  0x1a   : > { %2267 = dma.hbm_to_vmem [thread:$0]  (!%p2757_p6), %s294_s19, 2048, %s296_s23, [#allocation6], %s2653_s17, %s2653_s17, %s2654_s18  }
  0x1b   : > { %s340_s30 = sshll.u32 %s3109_s7, 4  ;;  %s2655_s2 = smov [#allocation11]   ;;  %s341_s30 = int_to_ptr.hbm [resolvable:$true] %s340_s30 }
  0x1c   : > { %2270 = dma.hbm_to_vmem [thread:$0]  (!%p2757_p6), %s311_s26, 4096, %s313_s12, [#allocation9], %s2653_s17, %s2653_s17, %s2654_s18  }
  0x1d   : > { %s342_s28 = sshll.u32 %s2655_s2, 4  ;;  %s2656_s19 = smov [#allocation10]   ;;  %s343_s28 = int_to_ptr.vmem [resolvable:$true] %s342_s28 }
  0x1e   : > { %2276 = dma.hbm_to_vmem [thread:$0]  (!%p2757_p6), %s341_s30, 16, %s343_s28, [#allocation12]  }
  0x1f   : > { %s328_s25 = sshll.u32 %s3110_s6, 4  ;;  %s330_s23 = sshll.u32 %s2656_s19, 4  ;;  %s329_s25 = int_to_ptr.hbm [resolvable:$true] %s328_s25  ;;  %s331_s23 = int_to_ptr.vmem [resolvable:$true] %s330_s23 }
  0x20   : > { %s3111_s8 = sld [smem:[#allocation30_spill]]  ;;  %s2657_s2 = smov [#allocation13]  }
  0x21   : > { %2273 = dma.hbm_to_vmem [thread:$0]  (!%p2757_p6), %s329_s25, 16, %s331_s23, [#allocation9]  }
  0x22   : > { %s353_s12 = sshll.u32 %s2657_s2, 4  ;;  %s1757_s30 = sadd.s32 4294967294, %s2649_s16   ;;  %s354_s12 = int_to_ptr.vmem [resolvable:$true] %s353_s12 }
  0x23   : > { %s2782_s22 = sadd.s32 1, %s2649_s16   ;;  %s38_s24 = sadd.s32 1, %s2645_s15 }
  0x24   : > { %3112 = sst [smem:[#allocation22_spill]] %s2782_s22  ;;  %s35_s28 = ssub.s32 %s2649_s16, %s2782_s22 }
  0x25   : > { %p45_p7 = scmp.ne.s32.totalorder %s2645_s15, %s2641_s14  ;;  %p36_p8 = scmp.eq.s32.totalorder %s35_s28, 0 }
  0x26   : > { %s351_s11 = sshll.u32 %s3111_s8, 4  ;;  %p46_p9 = scmp.eq.s32.totalorder %s2649_s16, 0  ;;  %s352_s11 = int_to_ptr.hbm [resolvable:$true] %s351_s11 }
  0x27   : > { %2279 = dma.hbm_to_vmem [thread:$0]  (!%p2757_p6), %s352_s11, 4096, %s354_s12, [#allocation12], %s2653_s17, %s2653_s17, %s2654_s18  }
  0x28   : > { %p51_p10 = scmp.ne.s32.totalorder %s2641_s14, %s2637_s13  ;;  %p269_p11 = scmp.eq.s32.totalorder %s2740_s20, 1 }
  0x29   : > { %s2794_s25 = scalar_select %p36_p8, %s2645_s15, %s38_s24  }
  0x2a   : > { %p2796_p12 = por %p46_p9, %p45_p7  ;;  %p2802_p13 = por %p52_p1, %p51_p10 }
  0x2b   : > { %3113 = sst [smem:[#allocation23_spill]] %s2794_s25  ;;  %p2806_p0 = por %p269_p11, %p45_p7 }
  0x2c   : > { %p275_p2 = scmp.eq.s32.totalorder %s1757_s30, 1  ;;  %p2296_p4 = scmp.lt.s32.totalorder %s2649_s16, 2 }
  0x2d   : > { %s2812_s18 = sand.u32 1, %s2645_s15   ;;  %s2147_s29 = sshll.u32 %s2649_s16, 6 }
  0x2e   : > { %p2814_p6 = por %p275_p2, %p51_p10  ;;  %s1765_s26 = sshll.u32 %s2812_s18, 6 }
  0x2f   : > { %s3119_s0 = sld [smem:[#allocation25_spill]]  ;;  %s374_s28 = scalar_lea.vmem [#allocation2], %s1765_s26 }
  0x30   : > { %s3117_s23 = scalar_select %p2814_p6, 1, 0 }
  0x31   : > { %s383_s4 = sshll.u32 %s374_s28, 4  ;;  %p2825_p7 = pnand %p2296_p4, %p2796_p12  ;;  %s384_s4 = int_to_ptr.vmem [resolvable:$true] %s383_s4 }
  0x32   : > { %3118 = sst [smem:[#allocation24_spill]] %s3117_s23  ;;  %s393_s6 = sand.u32 1, %s2649_s16  }
  0x33   : > { %s371_s7 = scalar_lea.sflag [#allocation3], %s2812_s18  ;;  %p2511_p9 = pneg %p2825_p7 }
  0x35   : > { %s380_s12 = scalar_lea.hbm %s3119_s0, %s2147_s29  ;;  %s2514_s29 = scalar_lea.hbm %s3119_s0, 128 }
  0x36   : > { %s381_s24 = sshll.u32 %s380_s12, 4  ;;  %s382_s24 = int_to_ptr.hbm [resolvable:$true] %s381_s24 }
  0x37   : > { %s2507_s8 = sshra.s32 %s382_s24, 4  ;;  %s2508_s8 = int_to_ptr.hbm [resolvable:$true] %s2507_s8 }
  0x38   : > { %s2509_s25 = scalar_lea.hbm %s2508_s8, 64  ;;  %p2515_p12 = scmp.lt.s32.totalorder %s2508_s8, %s3119_s0 }
  0x39   : > { %p2510_p8 = scmp.ne.s32.totalorder %s2508_s8, %s2509_s25  ;;  %p2516_p2 = scmp.lt.s32.totalorder %s2514_s29, %s2509_s25 }
  0x3b   : > { %p2512_p10 = pnand %p2511_p9, %p2510_p8  ;;  %p2517_p4 = por %p2516_p2, %p2515_p12 }
  0x3d   : > { %p2513_p11 = pneg %p2512_p10 }
  0x3f   : > { %p2518_p5 = pnand %p2517_p4, %p2513_p11 }
  0x41   : > { %2521 = shalt.err (!%p2518_p5)
}
  0x42   : > { %s2658_s12 = smov 64   ;;  %s2659_s28 = smov 4  }
  0x43   : > { %2283 = dma.hbm_to_vmem [thread:$0]  (!%p2825_p7), %s382_s24, 1024, %s384_s4, %s371_s7, %s2658_s12, %s2658_s12, %s2659_s28  }
  0x44   : > { %s1769_s15 = sshll.u32 %s2812_s18, 3  ;;  %s1770_s22 = sshll.u32 %s2649_s16, 3 }
  0x45   : > { %s401_s23 = scalar_lea.hbm %s3084_s1, %s1770_s22  ;;  %s397_s8 = scalar_lea.vmem [#allocation5], %s1769_s15 }
  0x46   : > { %s403_s11 = sshll.u32 %s401_s23, 4  ;;  %s405_s25 = sshll.u32 %s397_s8, 4  ;;  %s404_s11 = int_to_ptr.hbm [resolvable:$true] %s403_s11  ;;  %s406_s25 = int_to_ptr.vmem [resolvable:$true] %s405_s25 }
  0x47   : > { %s394_s29 = scalar_lea.sflag [#allocation6], %s393_s6  ;;  %s2537_s2 = sshra.s32 %s404_s11, 4  ;;  %s2538_s2 = int_to_ptr.hbm [resolvable:$true] %s2537_s2 }
  0x48   : > { %s2539_s0 = scalar_lea.hbm %s2538_s2, 8  ;;  %s2544_s18 = scalar_lea.hbm %s3084_s1, 16 }
  0x49   : > { %p2540_p5 = scmp.ne.s32.totalorder %s2538_s2, %s2539_s0  ;;  %p2545_p11 = scmp.lt.s32.totalorder %s2538_s2, %s3084_s1 }
  0x4a   : > { %p2546_p12 = scmp.lt.s32.totalorder %s2544_s18, %s2539_s0 }
  0x4b   : > { %p2542_p8 = pnand %p2540_p5, %p2511_p9 }
  0x4c   : > { %p2547_p2 = por %p2546_p12, %p2545_p11 }
  0x4d   : > { %p2543_p10 = pneg %p2542_p8 }
  0x4f   : > { %p2548_p4 = pnand %p2547_p2, %p2543_p10 }
  0x51   : > { %2551 = shalt.err (!%p2548_p4)
}
  0x52   : > { %2286 = dma.hbm_to_vmem [thread:$0]  (!%p2825_p7), %s404_s11, 128, %s406_s25, %s394_s29  }
  0x53   : > { %414 = sbr.rel (%p2745_p3) target bundleno = 1123 (0x463), region = 60  ;;  %s2863_s6 = sand.u32 (!%p2745_p3), 1, %s2641_s14  }
  0x54   : > { %s1772_s15 = sshll.u32 (!%p2745_p3), %s2863_s6, 6  ;;  %s417_s23 = scalar_lea.sflag (!%p2745_p3), [#allocation3], %s2863_s6 }
  0x55   : > { %s2867_s12 = scalar_lea.vmem (!%p2745_p3), [#allocation2], %s1772_s15 }
  0x58   : > { %2612 = dma.done.wait (%p2802_p13), %s417_s23, 1024  }
  0x59   : > { %2614 = vsyncadd (%p2802_p13), %s417_s23, 4294966272  ;;  %s426_s0 = sand.u32 1, %s2740_s20   ;;  %s1773_s21 = sshll.u32 %s2863_s6, 3 }
  0x5a   : > { %s427_s30 = scalar_lea.sflag [#allocation6], %s426_s0  ;;  %s430_s28 = scalar_lea.vmem [#allocation5], %s1773_s21 }
  0x5b   : > { %2616 = dma.done.wait (%p2802_p13), %s427_s30, 128  }
  0x5c   : > { %2618 = vsyncadd (%p2802_p13), %s427_s30, 4294967168 }
  0x5d   : > { %2620 = dma.done.wait (%p52_p1), [#allocation6], 2048  }
  0x5e   : > { %2622 = vsyncadd (%p52_p1), [#allocation6], 4294965248 }
  0x5f   : > { %2624 = dma.done.wait (%p52_p1), [#allocation9], 4112  }
  0x60   : > { %2626 = vsyncadd (%p52_p1), [#allocation9], 4294963184 }
  0x61   : > { %2628 = dma.done.wait (%p52_p1), [#allocation12], 4112  }
  0x62   : > { %2630 = vsyncadd (%p52_p1), [#allocation12], 4294963184  ;;  %v2148_v0 = vld [vmem:[%s2867_s12] sm:$0xff]  ;;  %v2149_v1 = vld [vmem:[%s2867_s12 + $0x8] sm:$0xff]  ;;  %vm553_vm0 = vcmask 130048   ;;  %vm520_vm1 = vcmask 1040384  }
  0x63   : > { %v516_v2 = vld [vmem:[%s430_s28] sm:$0xff]  ;;  %v2150_v4 = vld [vmem:[%s2867_s12 + $0x10] sm:$0xff]  ;;  %v2151_v5 = vld [vmem:[%s2867_s12 + $0x18] sm:$0xff]  ;;  %564 = vmatpush.bf16.msra.mxu2 %v2148_v0  ;;  %588 = vmatpush.bf16.msra.mxu3 %v2149_v1  ;;  %vm529_vm2 = vcmask 1042434   ;;  %vm525_vm3 = vcmask 1041409   ;;  %vm533_vm4 = vcmask 1043459  }
  0x64   : > { %v517_v3 = vpack.c.bf16 %v516_v2, %v516_v2  ;;  %v738_v6 = vsel %vm553_vm0, %v516_v2, 0.0  ;;  %v2152_v7 = vld [vmem:[%s2867_s12 + $0x20] sm:$0xff]  ;;  %v2153_v8 = vld [vmem:[%s2867_s12 + $0x28] sm:$0xff]  ;;  %v2154_v15 = vld [vmem:[%s2867_s12 + $0x30] sm:$0xff]  ;;  %vm790_vm5 = vcmask 1044484   ;;  %vm793_vm6 = vcmask 1045509  }
  0x65   : > { %739 = vadd.xlane.f32.xlu0 %v738_v6  ;;  %660 = vmatpush.bf16.msra.mxu0 %v2152_v7  ;;  %v2155_v19 = vld [vmem:[%s2867_s12 + $0x38] sm:$0xff]  ;;  %vm796_vm7 = vcmask 1046534   ;;  %vm799_vm8 = vcmask 1047559   ;;  %s2236_s27 = smul.u32 24, %s2863_s6  ;;  %s2587_s30 = scalar_lea.hbm %s3093_s10, 48 }
  0x66   : > { %v519_v9 = vrot.slane %v517_v3, 3  ;;  %684 = vmatpush.bf16.msra.mxu1 %v2153_v8  ;;  %s2237_s4 = smul.u32 24, %s2740_s20  ;;  %s1601_s20 = scalar_lea.sflag [#allocation4], %s2863_s6 }
  0x67   : > { %612 = vmatpush.bf16.msrb.mxu2 %v2150_v4  ;;  %636 = vmatpush.bf16.msrb.mxu3 %v2151_v5  ;;  %s3019_s26 = scalar_lea.vmem [#allocation14], %s2236_s27 }
  0x68   : > { %v523_v10 = vsel %vm520_vm1, %v517_v3, %v519_v9  ;;  %v530_v11 = vsel %vm529_vm2, %v517_v3, %v519_v9  ;;  %v526_v18 = vsel %vm525_vm3, %v517_v3, %v519_v9  ;;  %v534_v32 = vsel %vm533_vm4, %v517_v3, %v519_v9  ;;  %s1612_s24 = scalar_lea.hbm %s3093_s10, %s2237_s4  ;;  %s1614_s22 = sshll.u32 %s3019_s26, 4  ;;  %s1615_s22 = int_to_ptr.vmem [resolvable:$true] %s1614_s22 }
  0x69   : > { %v1779_v12 = vpack.i.b16 %v523_v10, %v523_v10  ;;  %v538_v13 = vunpack.i.h.s16 %v523_v10  ;;  %v532_v14 = vrot.slane %v530_v11, 2  ;;  %v528_v25 = vrot.slane %v526_v18, 1  ;;  %s1616_s15 = sshll.u32 %s1612_s24, 4  ;;  %s1617_s15 = int_to_ptr.hbm [resolvable:$true] %s1616_s15 }
  0x6a   : > { %v536_v33 = vrot.slane %v534_v32, 3  ;;  %v2171_v32 = vld [vmem:[#allocation7 + $0x74] sm:$0xf0]  ;;  %s2581_s23 = sshra.s32 %s1617_s15, 4  ;;  %s2582_s23 = int_to_ptr.hbm [resolvable:$true] %s2581_s23 }
  0x6b   : > { %v546_v16 = vperm.slane %v1779_v12, 0  ;;  %v570_v17 = vpack.i.b16 %v538_v13, %v538_v13  ;;  %v1801_v20 = vpack.i.b16 %v532_v14, %v532_v14  ;;  %v542_v21 = vunpack.i.h.s16 %v532_v14  ;;  %s2583_s12 = scalar_lea.hbm %s2582_s23, 24  ;;  %p2588_p7 = scmp.lt.s32.totalorder %s2582_s23, %s3093_s10 }
  0x6c   : > { %v540_v27 = vunpack.i.h.s16 %v528_v25  ;;  %v1790_v28 = vpack.i.b16 %v528_v25, %v528_v25  ;;  %v544_v34 = vunpack.i.h.s16 %v536_v33  ;;  %v1812_v35 = vpack.i.b16 %v536_v33, %v536_v33  ;;  %v2170_v33 = vld [vmem:[#allocation7 + $0x74] sm:$0xf]  ;;  %p2584_p1 = scmp.ne.s32.totalorder %s2582_s23, %s2583_s12  ;;  %p2589_p9 = scmp.lt.s32.totalorder %s2587_s30, %s2583_s12 }
  0x6d   : > { %1784 = vmatmul.msk.bf16.vlgmr.msra.gmra.mxu2 %vm553_vm0, %v546_v16  ;;  %v571_v22 = vperm.slane %v570_v17, 0  ;;  %v643_v23 = vperm.slane %v1801_v20, 0  ;;  %v666_v24 = vpack.i.b16 %v542_v21, %v542_v21 }
  0x6e   : > { %708 = vmatpush.bf16.msra.mxu2 %v2154_v15  ;;  %v618_v29 = vpack.i.b16 %v540_v27, %v540_v27  ;;  %v595_v30 = vperm.slane %v1790_v28, 0  ;;  %v714_v36 = vpack.i.b16 %v544_v34, %v544_v34  ;;  %v691_v37 = vperm.slane %v1812_v35, 0  ;;  %v1883_v35 = vld [vmem:[#allocation7 + $0x78] sm:$0xf0]  ;;  %p2585_p3 = pnand %p2584_p1, %p2806_p0  ;;  %p2590_p5 = por %p2589_p9, %p2588_p7 }
  0x6f   : > { %1789 = vmatmul.msk.bf16.vlgmr.msra.gmra.mxu3 %vm553_vm0, %v571_v22  ;;  %1806 = vmatmul.msk.bf16.vlgmr.msra.gmra.mxu0 %vm553_vm0, %v643_v23  ;;  %v667_v26 = vperm.slane %v666_v24, 0 }
  0x70   : > { %732 = vmatpush.bf16.msra.mxu3 %v2155_v19  ;;  %v619_v31 = vperm.slane %v618_v29, 0  ;;  %v715_v38 = vperm.slane %v714_v36, 0  ;;  %v1886_v36 = vor.u32 %v2170_v33, %v1883_v35  ;;  %p2586_p13 = pneg %p2585_p3 }
  0x71   : > { %1811 = vmatmul.msk.bf16.vlgmr.msra.gmra.mxu1 %vm553_vm0, %v667_v26 }
  0x72   : > { %998 = vmatpush.bf16.msrb.mxu1 %v1886_v36  ;;  %v2202_v36 = vld [vmem:[#allocation8 + $0xf4] sm:$0xf]  ;;  %p2591_p8 = pnand %p2590_p5, %p2586_p13 }
  0x7d   : > { %1795 = vmatmul.msk.bf16.vlgmr.msrb.gmra.mxu2 %vm553_vm0, %v595_v30 }
  0x7f   : > { %1800 = vmatmul.msk.bf16.vlgmr.msrb.gmra.mxu3 %vm553_vm0, %v619_v31  ;;  %v1881_v31 = vld [vmem:[#allocation7 + $0x70] sm:$0xf] }
  0x80   : > { %v1882_v34 = vor.u32 %v2171_v32, %v1881_v31  ;;  %v2186_v31 = vld [vmem:[#allocation8 + $0x74] sm:$0xf]  ;;  %v1947_v32 = vld [vmem:[#allocation8 + $0x78] sm:$0xf0] }
  0x81   : > { %v1950_v35 = vor.u32 %v2186_v31, %v1947_v32 }
  0x82   : > { %985 = vmatpush.bf16.msrb.mxu0 %v1882_v34 }
  0x8d   : > { %1817 = vmatmul.msk.bf16.vlgmr.msra.gmra.mxu2 %vm553_vm0, %v691_v37  ;;  %v1873_v37 = vld [vmem:[#allocation7 + $0x60] sm:$0xf] }
  0x8f   : > { %1822 = vmatmul.msk.bf16.vlgmr.msra.gmra.mxu3 %vm553_vm0, %v715_v38  ;;  %v2169_v38 = vld [vmem:[#allocation7 + $0x64] sm:$0xf0] }
  0xd8   : > { %v740_v39 = vpop.xlane.xlu0 %739 }
  0xd9   : > { %v741_v41 = vmax.f32 %v740_v39, 1e-09  ;;  %v2168_v39 = vld [vmem:[#allocation7 + $0x64] sm:$0xf] }
  0xdb   : > { %2347 = vrcp.f32 %v741_v41  ;;  %v1875_v41 = vld [vmem:[#allocation7 + $0x68] sm:$0xf0] }
  0xe1   : > { %v2348_v48 = vpop.eup %2347 }
  0xe2   : > { %v744_v50 = vrot.slane %v2348_v48, 1  ;;  %v745_v51 = vrot.slane %v2348_v48, 2  ;;  %v746_v54 = vrot.slane %v2348_v48, 3  ;;  %v747_v57 = vrot.slane %v2348_v48, 4 }
  0xe3   : > { %v748_v62 = vrot.slane %v2348_v48, 5  ;;  %v749_v13 = vrot.slane %v2348_v48, 6  ;;  %v750_v17 = vrot.slane %v2348_v48, 7 }
  0xec   : > { %v662_v40 = vpop.f32.mrf.mxu0 }
  0xed   : > { %v2923_v63 = vmul.f32 %v747_v57, %v662_v40  ;;  %v1874_v40 = vor.u32 %v2169_v38, %v1873_v37  ;;  %v1849_v57 = vld [vmem:[#allocation7 + $0x30] sm:$0xf]  ;;  %v2011_v37 = vld [vmem:[#allocation8 + $0xf8] sm:$0xf0]  ;;  %v1937_v38 = vld [vmem:[#allocation8 + $0x60] sm:$0xf] }
  0xee   : > { %v686_v42 = vpop.f32.mrf.mxu1 }
  0xef   : > { %v2929_v5 = vmul.f32 %v748_v62, %v686_v42  ;;  %v771_v7 = vmul.f32 %v2923_v63, %v2923_v63  ;;  %v1878_v42 = vor.u32 %v2168_v39, %v1875_v41  ;;  %986 = vmatpush.bf16.msrb.mxu0 %v1874_v40  ;;  %v2014_v39 = vor.u32 %v2202_v36, %v2011_v37  ;;  %v2185_v40 = vld [vmem:[#allocation8 + $0x64] sm:$0xf0]  ;;  %v2001_v41 = vld [vmem:[#allocation8 + $0xe0] sm:$0xf] }
  0xf0   : > { %v566_v43 = vpop.f32.mrf.mxu2 }
  0xf1   : > { %v2921_v61 = vmul.f32 %v2348_v48, %v566_v43  ;;  %v772_v11 = vmul.f32 %v2929_v5, %v2929_v5  ;;  %v789_v12 = vrot.slane %v771_v7, 4  ;;  %999 = vmatpush.bf16.msrb.mxu1 %v1878_v42  ;;  %v1865_v43 = vld [vmem:[#allocation7 + $0x50] sm:$0xf] }
  0xf2   : > { %v590_v44 = vpop.f32.mrf.mxu3 }
  0xf3   : > { %v2911_v52 = vmul.f32 %v744_v50, %v590_v44  ;;  %v767_v4 = vmul.f32 %v2921_v61, %v2921_v61  ;;  %v792_v18 = vrot.slane %v772_v11, 3  ;;  %v2167_v44 = vld [vmem:[#allocation7 + $0x54] sm:$0xf0]  ;;  %v2165_v50 = vld [vmem:[#allocation7 + $0x44] sm:$0xf0] }
  0xf4   : > { %v664_v45 = vpop.f32.mrf.mxu0  ;;  %v2158_v11 = vld [vmem:[#allocation7 + $0x14] sm:$0xf] }
  0xf5   : > { %v768_v58 = vmul.f32 %v2911_v52, %v2911_v52  ;;  %v2166_v45 = vld [vmem:[#allocation7 + $0x54] sm:$0xf] }
  0xf6   : > { %v688_v46 = vpop.f32.mrf.mxu1 }
  0xf7   : > { %v783_v0 = vrot.slane %v768_v58, 7  ;;  %v1866_v46 = vor.u32 %v2167_v44, %v1865_v43  ;;  %v2163_v58 = vld [vmem:[#allocation7 + $0x34] sm:$0xf0]  ;;  %v1938_v43 = vor.u32 %v2185_v40, %v1937_v38  ;;  %v2201_v44 = vld [vmem:[#allocation8 + $0xe4] sm:$0xf0] }
  0xf8   : > { %v568_v47 = vpop.f32.mrf.mxu2  ;;  %v1850_v62 = vor.u32 %v2163_v58, %v1849_v57  ;;  %v1993_v57 = vld [vmem:[#allocation8 + $0xd0] sm:$0xf] }
  0xf9   : > { %v784_v8 = vsel %vm525_vm3, %v783_v0, %v767_v4  ;;  %v1867_v47 = vld [vmem:[#allocation7 + $0x58] sm:$0xf0]  ;;  %987 = vmatpush.bf16.msrb.mxu0 %v1866_v46  ;;  %v2160_v4 = vld [vmem:[#allocation7 + $0x24] sm:$0xf]  ;;  %v1939_v46 = vld [vmem:[#allocation8 + $0x68] sm:$0xf0] }
  0xfa   : > { %v592_v49 = vpop.f32.mrf.mxu3  ;;  %v1870_v48 = vor.u32 %v2166_v45, %v1867_v47  ;;  %v1851_v0 = vld [vmem:[#allocation7 + $0x38] sm:$0xf0]  ;;  %v2184_v45 = vld [vmem:[#allocation8 + $0x64] sm:$0xf]  ;;  %v2002_v47 = vor.u32 %v2201_v44, %v2001_v41 }
  0xfb   : > { %v1857_v49 = vld [vmem:[#allocation7 + $0x40] sm:$0xf] }
  0xfc   : > { %1000 = vmatpush.bf16.msrb.mxu1 %v1870_v48  ;;  %v1942_v48 = vor.u32 %v2184_v45, %v1939_v46 }
 0x100   : > { %v614_v53 = vpop.f32.mrf.mxu2 }
 0x101   : > { %v2913_v55 = vmul.f32 %v745_v51, %v614_v53  ;;  %v2164_v51 = vld [vmem:[#allocation7 + $0x44] sm:$0xf]  ;;  %v1858_v53 = vor.u32 %v2165_v50, %v1857_v49  ;;  %v2003_v50 = vld [vmem:[#allocation8 + $0xe8] sm:$0xf0] }
 0x102   : > { %v638_v56 = vpop.f32.mrf.mxu3  ;;  %v2200_v49 = vld [vmem:[#allocation8 + $0xe4] sm:$0xf] }
 0x103   : > { %v2917_v59 = vmul.f32 %v746_v54, %v638_v56  ;;  %v769_v60 = vmul.f32 %v2913_v55, %v2913_v55  ;;  %v1859_v54 = vld [vmem:[#allocation7 + $0x48] sm:$0xf0]  ;;  %988 = vmatpush.bf16.msrb.mxu0 %v1858_v53 }
 0x104   : > { %v1862_v56 = vor.u32 %v2164_v51, %v1859_v54  ;;  %v1929_v51 = vld [vmem:[#allocation8 + $0x50] sm:$0xf]  ;;  %v2006_v54 = vor.u32 %v2200_v49, %v2003_v50  ;;  %v2178_v49 = vld [vmem:[#allocation8 + $0x34] sm:$0xf]  ;;  %v1915_v50 = vld [vmem:[#allocation8 + $0x38] sm:$0xf0] }
 0x105   : > { %v770_v1 = vmul.f32 %v2917_v59, %v2917_v59  ;;  %v785_v3 = vrot.slane %v769_v60, 6  ;;  %v2162_v60 = vld [vmem:[#allocation7 + $0x34] sm:$0xf] }
 0x106   : > { %1001 = vmatpush.bf16.msrb.mxu1 %v1862_v56  ;;  %v2183_v56 = vld [vmem:[#allocation8 + $0x54] sm:$0xf0] }
 0x107   : > { %v787_v9 = vrot.slane %v770_v1, 5  ;;  %v786_v10 = vsel %vm529_vm2, %v785_v3, %v784_v8  ;;  %v1841_v1 = vld [vmem:[#allocation7 + $0x20] sm:$0xf]  ;;  %v1854_v3 = vor.u32 %v2162_v60, %v1851_v0  ;;  %989 = vmatpush.bf16.msrb.mxu0 %v1850_v62  ;;  %v1930_v58 = vor.u32 %v2183_v56, %v1929_v51  ;;  %v2199_v60 = vld [vmem:[#allocation8 + $0xd4] sm:$0xf0] }
 0x108   : > { %v616_v2 = vpop.f32.mrf.mxu2  ;;  %v2182_v62 = vld [vmem:[#allocation8 + $0x54] sm:$0xf]  ;;  %v1931_v0 = vld [vmem:[#allocation8 + $0x58] sm:$0xf0] }
 0x109   : > { %v788_v14 = vsel %vm533_vm4, %v787_v9, %v786_v10  ;;  %v2161_v2 = vld [vmem:[#allocation7 + $0x24] sm:$0xf0]  ;;  %v1833_v9 = vld [vmem:[#allocation7 + $0x10] sm:$0xf]  ;;  %v2159_v10 = vld [vmem:[#allocation7 + $0x14] sm:$0xf0] }
 0x10a   : > { %v640_v6 = vpop.f32.mrf.mxu3  ;;  %v791_v22 = vsel %vm790_vm5, %v789_v12, %v788_v14  ;;  %v1842_v7 = vor.u32 %v2161_v2, %v1841_v1  ;;  %1002 = vmatpush.bf16.msrb.mxu1 %v1854_v3  ;;  %v1835_v12 = vld [vmem:[#allocation7 + $0x18] sm:$0xf0]  ;;  %v1994_v2 = vor.u32 %v2199_v60, %v1993_v57  ;;  %v1934_v3 = vor.u32 %v2182_v62, %v1931_v0  ;;  %v2194_v51 = vld [vmem:[#allocation8 + $0xb4] sm:$0xf]  ;;  %v2177_v0 = vld [vmem:[#allocation8 + $0x24] sm:$0xf0] }
 0x10b   : > { %v794_v25 = vsel %vm793_vm6, %v792_v18, %v791_v22  ;;  %v1843_v6 = vld [vmem:[#allocation7 + $0x28] sm:$0xf0]  ;;  %v1838_v14 = vor.u32 %v2158_v11, %v1835_v12  ;;  %v2156_v18 = vld [vmem:[#allocation7 + $0x4] sm:$0xf]  ;;  %v2197_v12 = vld [vmem:[#allocation8 + $0xc4] sm:$0xf0] }
 0x10c   : > { %v1846_v8 = vor.u32 %v2160_v4, %v1843_v6  ;;  %990 = vmatpush.bf16.msrb.mxu0 %v1842_v7  ;;  %v2198_v4 = vld [vmem:[#allocation8 + $0xd4] sm:$0xf]  ;;  %v1995_v6 = vld [vmem:[#allocation8 + $0xd8] sm:$0xf0] }
 0x10d   : > { %v1998_v7 = vor.u32 %v2198_v4, %v1995_v6  ;;  %v1979_v57 = vld [vmem:[#allocation8 + $0xb8] sm:$0xf0] }
 0x10e   : > { %1003 = vmatpush.bf16.msrb.mxu1 %v1846_v8  ;;  %v1921_v8 = vld [vmem:[#allocation8 + $0x40] sm:$0xf] }
 0x110   : > { %v710_v15 = vpop.f32.mrf.mxu2 }
 0x111   : > { %v2938_v16 = vmul.f32 %v749_v13, %v710_v15  ;;  %v1834_v13 = vor.u32 %v2159_v10, %v1833_v9  ;;  %v1825_v15 = vld [vmem:[#allocation7] sm:$0xf]  ;;  %v2181_v9 = vld [vmem:[#allocation8 + $0x44] sm:$0xf0] }
 0x112   : > { %v734_v19 = vpop.f32.mrf.mxu3  ;;  %1004 = vmatpush.bf16.msrb.mxu1 %v1838_v14  ;;  %v1985_v10 = vld [vmem:[#allocation8 + $0xc0] sm:$0xf]  ;;  %v1923_v14 = vld [vmem:[#allocation8 + $0x48] sm:$0xf0] }
 0x113   : > { %v773_v20 = vmul.f32 %v2938_v16, %v2938_v16  ;;  %v2942_v21 = vmul.f32 %v750_v17, %v734_v19  ;;  %v2157_v17 = vld [vmem:[#allocation7 + $0x4] sm:$0xf0]  ;;  %v1827_v19 = vld [vmem:[#allocation7 + $0x8] sm:$0xf0]  ;;  %991 = vmatpush.bf16.msrb.mxu0 %v1834_v13  ;;  %v2180_v13 = vld [vmem:[#allocation8 + $0x44] sm:$0xf] }
 0x115   : > { %v795_v23 = vrot.slane %v773_v20, 2  ;;  %v774_v24 = vmul.f32 %v2942_v21, %v2942_v21 }
 0x117   : > { %v798_v26 = vrot.slane %v774_v24, 1  ;;  %v797_v27 = vsel %vm796_vm7, %v795_v23, %v794_v25  ;;  %v1826_v23 = vor.u32 %v2157_v17, %v1825_v15  ;;  %v1830_v24 = vor.u32 %v2156_v18, %v1827_v19  ;;  %v1945_v25 = vld [vmem:[#allocation8 + $0x70] sm:$0xf]  ;;  %v2196_v18 = vld [vmem:[#allocation8 + $0xc4] sm:$0xf] }
 0x118   : > { %v712_v28 = vpop.f32.mrf.mxu2  ;;  %v1922_v15 = vor.u32 %v2181_v9, %v1921_v8  ;;  %v1986_v17 = vor.u32 %v2197_v12, %v1985_v10  ;;  %v1987_v19 = vld [vmem:[#allocation8 + $0xc8] sm:$0xf0]  ;;  %v2176_v12 = vld [vmem:[#allocation8 + $0x24] sm:$0xf] }
 0x119   : > { %v800_v29 = vsel %vm799_vm8, %v798_v26, %v797_v27  ;;  %992 = vmatpush.bf16.msrb.mxu0 %v1826_v23  ;;  %1005 = vmatpush.bf16.msrb.mxu1 %v1830_v24  ;;  %v2187_v26 = vld [vmem:[#allocation8 + $0x74] sm:$0xf0]  ;;  %v2009_v27 = vld [vmem:[#allocation8 + $0xf0] sm:$0xf]  ;;  %v1926_v23 = vor.u32 %v2180_v13, %v1923_v14  ;;  %v1990_v24 = vor.u32 %v2196_v18, %v1987_v19  ;;  %v1907_v13 = vld [vmem:[#allocation8 + $0x28] sm:$0xf0] }
 0x11a   : > { %v736_v30 = vpop.f32.mrf.mxu3  ;;  %802 = vadd.xlane.f32.xlu0 %v800_v29  ;;  %v1946_v29 = vor.u32 %v2187_v26, %v1945_v25  ;;  %v1982_v18 = vor.u32 %v2194_v51, %v1979_v57 }
 0x11b   : > { %v2203_v30 = vld [vmem:[#allocation8 + $0xf4] sm:$0xf0] }
 0x11c   : > { %v2010_v34 = vor.u32 %v2203_v30, %v2009_v27  ;;  %1212 = vmatpush.bf16.msrb.mxu2 %v1946_v29 }
 0x11d   : > { %1238 = vmatpush.bf16.msra.mxu0 %v1950_v35  ;;  %1251 = vmatpush.bf16.msra.mxu1 %v2014_v39 }
 0x11e   : > { %1225 = vmatpush.bf16.msrb.mxu3 %v2010_v34 }
 0x120   : > { %1213 = vmatpush.bf16.msrb.mxu2 %v1938_v43  ;;  %v2179_v43 = vld [vmem:[#allocation8 + $0x34] sm:$0xf0] }
 0x121   : > { %1239 = vmatpush.bf16.msra.mxu0 %v1942_v48  ;;  %1252 = vmatpush.bf16.msra.mxu1 %v2006_v54  ;;  %v2195_v48 = vld [vmem:[#allocation8 + $0xb4] sm:$0xf0] }
 0x122   : > { %1226 = vmatpush.bf16.msrb.mxu3 %v2002_v47  ;;  %v1977_v47 = vld [vmem:[#allocation8 + $0xb0] sm:$0xf] }
 0x124   : > { %1214 = vmatpush.bf16.msrb.mxu2 %v1930_v58  ;;  %v1905_v58 = vld [vmem:[#allocation8 + $0x20] sm:$0xf] }
 0x125   : > { %1240 = vmatpush.bf16.msra.mxu0 %v1934_v3  ;;  %1253 = vmatpush.bf16.msra.mxu1 %v1998_v7  ;;  %v2193_v7 = vld [vmem:[#allocation8 + $0xa4] sm:$0xf0] }
 0x126   : > { %1227 = vmatpush.bf16.msrb.mxu3 %v1994_v2 }
 0x128   : > { %1215 = vmatpush.bf16.msrb.mxu2 %v1922_v15  ;;  %v1978_v15 = vor.u32 %v2195_v48, %v1977_v47  ;;  %v1889_v48 = vld [vmem:[#allocation8] sm:$0xf] }
 0x129   : > { %1241 = vmatpush.bf16.msra.mxu0 %v1926_v23  ;;  %1254 = vmatpush.bf16.msra.mxu1 %v1990_v24  ;;  %v1906_v23 = vor.u32 %v2177_v0, %v1905_v58 }
 0x12a   : > { %1228 = vmatpush.bf16.msrb.mxu3 %v1986_v17  ;;  %v1918_v17 = vor.u32 %v2178_v49, %v1915_v50  ;;  %v2173_v49 = vld [vmem:[#allocation8 + $0x4] sm:$0xf0]  ;;  %v1953_v50 = vld [vmem:[#allocation8 + $0x80] sm:$0xf] }
 0x12b   : > { %v1890_v51 = vor.u32 %v2173_v49, %v1889_v48  ;;  %v2217_v48 = vld [vmem:[#allocation13 + $0x64] sm:$0xf0]  ;;  %v2216_v49 = vld [vmem:[#allocation13 + $0x64] sm:$0xf] }
 0x12d   : > { %1242 = vmatpush.bf16.msra.mxu0 %v1918_v17  ;;  %1255 = vmatpush.bf16.msra.mxu1 %v1982_v18  ;;  %v840_v18 = vld [vmem:[%s3088_s5] sm:$0x3] }
 0x12e   : > { %1229 = vmatpush.bf16.msrb.mxu3 %v1978_v15 }
 0x18d   : > { %v803_v20 = vpop.xlane.xlu0 %802 }
 0x18e   : > { %v2950_v22 = vmax.f32 %v803_v20, 1e-24 }
 0x190   : > { %2349 = vrsqrt.f32 %v2950_v22  ;;  %vm811_vm10 = vweird.f32 %v2950_v22 }
 0x196   : > { %v2350_v28 = vpop.eup %2349 }
 0x197   : > { %v806_v33 = vmul.f32 %v2350_v28, %v2950_v22  ;;  %vm812_vm9 = vweird.f32 %v2350_v28 }
 0x198   : > { %vm813_vm11 = vmor %vm811_vm10, %vm812_vm9 }
 0x199   : > { %v807_v42 = vmul.f32 %v2350_v28, %v806_v33 }
 0x19b   : > { %v808_v53 = vmul.f32 0.5, %v807_v42  ;;  %v1913_v42 = vld [vmem:[#allocation8 + $0x30] sm:$0xf] }
 0x19d   : > { %v809_v1 = vsub.f32 1.5, %v808_v53 }
 0x19f   : > { %v810_v11 = vmul.f32 %v2350_v28, %v809_v1  ;;  %v1969_v1 = vld [vmem:[#allocation8 + $0xa0] sm:$0xf] }
 0x1a0   : > { %v1970_v24 = vor.u32 %v2193_v7, %v1969_v1  ;;  %v839_v1 = vld [vmem:[%s3086_s3] sm:$0x3] }
 0x1a1   : > { %v814_v20 = vsel %vm813_vm11, %v2350_v28, %v810_v11  ;;  %v1914_v11 = vor.u32 %v2179_v43, %v1913_v42  ;;  %v1899_v43 = vld [vmem:[#allocation8 + $0x18] sm:$0xf0] }
 0x1a2   : > { %v816_v25 = vrot.slane %v814_v20, 1  ;;  %v817_v26 = vrot.slane %v814_v20, 2  ;;  %v2957_v27 = vmul.f32 %v814_v20, %v2921_v61  ;;  %v818_v22 = vrot.slane %v814_v20, 3  ;;  %1230 = vmatpush.bf16.msrb.mxu3 %v1970_v24 }
 0x1a3   : > { %v819_v29 = vrot.slane %v814_v20, 4  ;;  %v820_v30 = vrot.slane %v814_v20, 5  ;;  %v821_v31 = vrot.slane %v814_v20, 6  ;;  %v822_v32 = vrot.slane %v814_v20, 7  ;;  %1216 = vmatpush.bf16.msrb.mxu2 %v1914_v11 }
 0x1a4   : > { %v2960_v33 = vmul.f32 %v816_v25, %v2911_v52  ;;  %v2963_v28 = vmul.f32 %v817_v26, %v2913_v55  ;;  %v2966_v34 = vmul.f32 %v818_v22, %v2917_v59  ;;  %v844_v35 = vpack.c.bf16 %v2957_v27, %v2957_v27  ;;  %v2192_v25 = vld [vmem:[#allocation8 + $0xa4] sm:$0xf]  ;;  %v1971_v26 = vld [vmem:[#allocation8 + $0xa8] sm:$0xf0] }
 0x1a5   : > { %v2971_v61 = vmul.f32 %v819_v29, %v2923_v63  ;;  %v2974_v36 = vmul.f32 %v820_v30, %v2929_v5  ;;  %v2977_v37 = vmul.f32 %v821_v31, %v2938_v16  ;;  %v2980_v52 = vmul.f32 %v822_v32, %v2942_v21 }
 0x1a6   : > { %v845_v55 = vpack.c.bf16 %v2960_v33, %v2960_v33  ;;  %v846_v59 = vpack.c.bf16 %v2963_v28, %v2963_v28  ;;  %v847_v63 = vpack.c.bf16 %v2966_v34, %v2966_v34  ;;  %v881_v53 = vunpack.c.l.b16 %v844_v35 }
 0x1a7   : > { %v848_v5 = vpack.c.bf16 %v2971_v61, %v2971_v61  ;;  %v849_v16 = vpack.c.bf16 %v2974_v36, %v2974_v36  ;;  %v850_v21 = vpack.c.bf16 %v2977_v37, %v2977_v37  ;;  %v851_v38 = vpack.c.bf16 %v2980_v52, %v2980_v52  ;;  %1217 = vmatpush.bf16.msrb.mxu2 %v1906_v23 }
 0x1a8   : > { %v882_v39 = vunpack.c.l.b16 %v845_v55  ;;  %v883_v40 = vunpack.c.l.b16 %v846_v59  ;;  %v884_v41 = vunpack.c.l.b16 %v847_v63  ;;  %v1582_v62 = vrot.slane %v2960_v33, 7 }
 0x1a9   : > { %v885_v44 = vunpack.c.l.b16 %v848_v5  ;;  %v886_v45 = vunpack.c.l.b16 %v849_v16  ;;  %v887_v46 = vunpack.c.l.b16 %v850_v21  ;;  %v888_v60 = vunpack.c.l.b16 %v851_v38  ;;  %v2175_v38 = vld [vmem:[#allocation8 + $0x14] sm:$0xf0] }
 0x1aa   : > { %v889_v54 = vrot.slane %v882_v39, 7  ;;  %v891_v56 = vrot.slane %v883_v40, 6  ;;  %v893_v3 = vrot.slane %v884_v41, 5  ;;  %v1584_v6 = vrot.slane %v2963_v28, 6  ;;  %v1961_v39 = vld [vmem:[#allocation8 + $0x90] sm:$0xf] }
 0x1ab   : > { %v895_v4 = vrot.slane %v885_v44, 4  ;;  %v897_v9 = vrot.slane %v886_v45, 3  ;;  %v899_v10 = vrot.slane %v887_v46, 2  ;;  %v901_v20 = vrot.slane %v888_v60, 1  ;;  %v2174_v41 = vld [vmem:[#allocation8 + $0x14] sm:$0xf] }
 0x1ac   : > { %v890_v2 = vsel %vm525_vm3, %v889_v54, %v881_v53  ;;  %v1586_v29 = vrot.slane %v2966_v34, 5  ;;  %v1910_v30 = vor.u32 %v2176_v12, %v1907_v13  ;;  %v1583_v31 = vsel %vm525_vm3, %v1582_v62, %v2957_v27  ;;  %v2190_v44 = vld [vmem:[#allocation8 + $0x94] sm:$0xf]  ;;  %v1963_v45 = vld [vmem:[#allocation8 + $0x98] sm:$0xf0] }
 0x1ad   : > { %v892_v8 = vsel %vm529_vm2, %v891_v56, %v890_v2  ;;  %v1588_v33 = vrot.slane %v2971_v61, 4  ;;  %v1585_v28 = vsel %vm529_vm2, %v1584_v6, %v1583_v31  ;;  %v1590_v55 = vrot.slane %v2974_v36, 3  ;;  %v2189_v53 = vld [vmem:[#allocation8 + $0x84] sm:$0xf0]  ;;  %v2172_v54 = vld [vmem:[#allocation8 + $0x4] sm:$0xf] }
 0x1ae   : > { %v894_v14 = vsel %vm533_vm4, %v893_v3, %v892_v8  ;;  %v1974_v59 = vor.u32 %v2192_v25, %v1971_v26  ;;  %v1587_v34 = vsel %vm533_vm4, %v1586_v29, %v1585_v28  ;;  %v1592_v5 = vrot.slane %v2977_v37, 2  ;;  %1243 = vmatpush.bf16.msra.mxu0 %v1910_v30  ;;  %v1897_v37 = vld [vmem:[#allocation8 + $0x10] sm:$0xf]  ;;  %v1891_v56 = vld [vmem:[#allocation8 + $0x8] sm:$0xf0] }
 0x1af   : > { %v896_v19 = vsel %vm790_vm5, %v895_v4, %v894_v14  ;;  %v1589_v27 = vsel %vm790_vm5, %v1588_v33, %v1587_v34  ;;  %v1594_v16 = vrot.slane %v2980_v52, 1  ;;  %v1898_v40 = vor.u32 %v2175_v38, %v1897_v37  ;;  %v2191_v52 = vld [vmem:[#allocation8 + $0x94] sm:$0xf0]  ;;  %v2188_v60 = vld [vmem:[#allocation8 + $0x84] sm:$0xf] }
 0x1b0   : > { %v898_v22 = vsel %vm793_vm6, %v897_v9, %v896_v19  ;;  %v1591_v61 = vsel %vm793_vm6, %v1590_v55, %v1589_v27  ;;  %1256 = vmatpush.bf16.msra.mxu1 %v1974_v59  ;;  %v1962_v42 = vor.u32 %v2191_v52, %v1961_v39  ;;  %v1902_v46 = vor.u32 %v2174_v41, %v1899_v43  ;;  %v1955_v62 = vld [vmem:[#allocation8 + $0x88] sm:$0xf0]  ;;  %v2218_v27 = vld [vmem:[#allocation13 + $0x74] sm:$0xf] }
 0x1b1   : > { %v900_v32 = vsel %vm796_vm7, %v899_v10, %v898_v22  ;;  %v1593_v21 = vsel %vm796_vm7, %v1592_v5, %v1591_v61  ;;  %1218 = vmatpush.bf16.msrb.mxu2 %v1898_v40  ;;  %v1966_v47 = vor.u32 %v2190_v44, %v1963_v45  ;;  %v1954_v57 = vor.u32 %v2189_v53, %v1953_v50  ;;  %v2219_v5 = vld [vmem:[#allocation13 + $0x74] sm:$0xf0]  ;;  %v2075_v61 = vld [vmem:[#allocation13 + $0x78] sm:$0xf0] }
 0x1b2   : > { %v902_v35 = vsel %vm799_vm8, %v901_v20, %v900_v32  ;;  %v1595_v36 = vsel %vm799_vm8, %v1594_v16, %v1593_v21  ;;  %1231 = vmatpush.bf16.msrb.mxu3 %v1962_v42  ;;  %1244 = vmatpush.bf16.msra.mxu0 %v1902_v46  ;;  %v1894_v58 = vor.u32 %v2172_v54, %v1891_v56  ;;  %v869_v2 = vperm.slane %v839_v1, 0  ;;  %v2057_v54 = vld [vmem:[#allocation13 + $0x50] sm:$0xf]  ;;  %v2215_v56 = vld [vmem:[#allocation13 + $0x54] sm:$0xf0] }
 0x1b3   : > { %v903_v63 = vpack.c.b16 %v902_v35, %v902_v35  ;;  %1597 = vst [vmem:[%s3019_s26] sm:$0xff] %v1595_v36  ;;  %v1958_v0 = vor.u32 %v2188_v60, %v1955_v62  ;;  %v870_v3 = vperm.slane %v839_v1, 1  ;;  %v1048_v19 = vperm.slane %v840_v18, 0  ;;  %v2235_v60 = vld [vmem:[#allocation13 + $0xf4] sm:$0xf0]  ;;  %v2214_v62 = vld [vmem:[#allocation13 + $0x54] sm:$0xf] }
 0x1b4   : > { %1257 = vmatpush.bf16.msra.mxu1 %v1966_v47  ;;  %v1049_v24 = vperm.slane %v840_v18, 1  ;;  %v2660_v55 = vmov 128.0   ;;  %v2078_v21 = vor.u32 %v2218_v27, %v2075_v61  ;;  %v2065_v47 = vld [vmem:[#allocation13 + $0x60] sm:$0xf]  ;;  %v2131_v18 = vld [vmem:[#allocation13 + $0xe8] sm:$0xf0] }
 0x1b5   : > { %993 = vmatmul.bf16.vlgmr.msrb.gmra.mxu0 %v903_v63  ;;  %1006 = vmatmul.bf16.vlgmr.msrb.gmra.mxu1 %v903_v63  ;;  %2351 = vrcp.f32 %v2660_v55  ;;  %v2073_v63 = vld [vmem:[#allocation13 + $0x70] sm:$0xf]  ;;  %v2066_v50 = vor.u32 %v2217_v48, %v2065_v47  ;;  %v2209_v55 = vld [vmem:[#allocation13 + $0x24] sm:$0xf0]  ;;  %v2035_v27 = vld [vmem:[#allocation13 + $0x28] sm:$0xf0] }
 0x1b6   : > { %1219 = vmatpush.bf16.msrb.mxu2 %v1890_v51  ;;  %1232 = vmatpush.bf16.msrb.mxu3 %v1954_v57  ;;  %v2074_v16 = vor.u32 %v2219_v5, %v2073_v63  ;;  %v2067_v51 = vld [vmem:[#allocation13 + $0x68] sm:$0xf0]  ;;  %v2137_v57 = vld [vmem:[#allocation13 + $0xf0] sm:$0xf]  ;;  %v2229_v63 = vld [vmem:[#allocation13 + $0xc4] sm:$0xf0] }
 0x1b7   : > { %1245 = vmatpush.bf16.msra.mxu0 %v1894_v58  ;;  %v2070_v53 = vor.u32 %v2216_v49, %v2067_v51  ;;  %v2058_v58 = vor.u32 %v2215_v56, %v2057_v54  ;;  %v2138_v1 = vor.u32 %v2235_v60, %v2137_v57  ;;  %v2208_v5 = vld [vmem:[#allocation13 + $0x24] sm:$0xf]  ;;  %v2226_v49 = vld [vmem:[#allocation13 + $0xb4] sm:$0xf]  ;;  %v2205_v54 = vld [vmem:[#allocation13 + $0x4] sm:$0xf0] }
 0x1b8   : > { %1258 = vmatpush.bf16.msra.mxu1 %v1958_v0  ;;  %v2059_v0 = vld [vmem:[#allocation13 + $0x58] sm:$0xf0]  ;;  %v2038_v61 = vor.u32 %v2208_v5, %v2035_v27  ;;  %v2097_v56 = vld [vmem:[#allocation13 + $0xa0] sm:$0xf]  ;;  %v2225_v60 = vld [vmem:[#allocation13 + $0xa4] sm:$0xf0] }
 0x1ba   : > { %1522 = vmatpush.bf16.msra.mxu2 %v2074_v16  ;;  %1535 = vmatpush.bf16.msra.mxu3 %v2138_v1 }
 0x1bb   : > { %v2352_v59 = vpop.eup %2351  ;;  %1548 = vmatpush.bf16.msrb.mxu0 %v2078_v21  ;;  %v2228_v21 = vld [vmem:[#allocation13 + $0xc4] sm:$0xf] }
 0x1bc   : > { %v1269_v34 = vmul.f32 128.0, %v2352_v59  ;;  %vm1273_vm12 = vweird.f32 %v2352_v59 }
 0x1be   : > { %v1270_v36 = vsub.f32 1.0, %v1269_v34  ;;  %1523 = vmatpush.bf16.msra.mxu2 %v2066_v50  ;;  %v2107_v50 = vld [vmem:[#allocation13 + $0xb8] sm:$0xf0] }
 0x1bf   : > { %1549 = vmatpush.bf16.msrb.mxu0 %v2070_v53  ;;  %v2110_v51 = vor.u32 %v2226_v49, %v2107_v50  ;;  %v2017_v53 = vld [vmem:[#allocation13] sm:$0xf] }
 0x1c0   : > { %v1271_v37 = vmul.f32 %v2352_v59, %v1270_v36  ;;  %v2115_v36 = vld [vmem:[#allocation13 + $0xc8] sm:$0xf0] }
 0x1c2   : > { %v1272_v38 = vadd.f32 %v2352_v59, %v1271_v37  ;;  %1524 = vmatpush.bf16.msra.mxu2 %v2058_v58  ;;  %v2118_v37 = vor.u32 %v2228_v21, %v2115_v36  ;;  %v2018_v58 = vor.u32 %v2205_v54, %v2017_v53 }
 0x1c4   : > { %v3028_v39 = vsel %vm1273_vm12, %v2352_v59, %v1272_v38  ;;  %v2113_v59 = vld [vmem:[#allocation13 + $0xc0] sm:$0xf]  ;;  %v2025_v38 = vld [vmem:[#allocation13 + $0x10] sm:$0xf] }
 0x1c5   : > { %v2114_v16 = vor.u32 %v2229_v63, %v2113_v59  ;;  %v2346_v63 = vld [vmem:[#allocation11] ss:$0 sm:$0xff] }
 0x232   : > { %v994_v4 = vpop.f32.mrf.mxu0  ;;  %v1007_v6 = vpop.f32.mrf.mxu1 }
 0x233   : > { %v995_v7 = vadd.f32 %v994_v4, %v869_v2  ;;  %v1008_v8 = vadd.f32 %v1007_v6, %v870_v3  ;;  %v2062_v2 = vor.u32 %v2214_v62, %v2059_v0  ;;  %v2234_v3 = vld [vmem:[#allocation13 + $0xf4] sm:$0xf]  ;;  %v2139_v4 = vld [vmem:[#allocation13 + $0xf8] sm:$0xf0]  ;;  %v2204_v62 = vld [vmem:[#allocation13 + $0x4] sm:$0xf] }
 0x234   : > { %v2142_v6 = vor.u32 %v2234_v3, %v2139_v4  ;;  %v2019_v0 = vld [vmem:[#allocation13 + $0x8] sm:$0xf0]  ;;  %v2224_v4 = vld [vmem:[#allocation13 + $0xa4] sm:$0xf] }
 0x235   : > { %v1011_v9 = vmax.f32 %v995_v7, 0.0  ;;  %v1012_v10 = vmax.f32 %v1008_v8, 0.0  ;;  %1550 = vmatpush.bf16.msrb.mxu0 %v2062_v2  ;;  %v2049_v7 = vld [vmem:[#allocation13 + $0x40] sm:$0xf]  ;;  %v2213_v8 = vld [vmem:[#allocation13 + $0x44] sm:$0xf0]  ;;  %v2098_v2 = vor.u32 %v2225_v60, %v2097_v56  ;;  %v2022_v3 = vor.u32 %v2204_v62, %v2019_v0 }
 0x236   : > { %1561 = vmatpush.bf16.msrb.mxu1 %v2142_v6  ;;  %v2099_v6 = vld [vmem:[#allocation13 + $0xa8] sm:$0xf0] }
 0x237   : > { %v1013_v11 = vpack.c.bf16 %v1011_v9, %v1011_v9  ;;  %v1014_v12 = vpack.c.bf16 %v1012_v10, %v1012_v10  ;;  %v2129_v9 = vld [vmem:[#allocation13 + $0xe0] sm:$0xf]  ;;  %v2050_v10 = vor.u32 %v2213_v8, %v2049_v7  ;;  %v2102_v7 = vor.u32 %v2224_v4, %v2099_v6  ;;  %v2089_v8 = vld [vmem:[#allocation13 + $0x90] sm:$0xf] }
 0x239   : > { %1220 = vmatmul.bf16.vlgmr.msrb.gmra.mxu2 %v1013_v11  ;;  %1233 = vmatmul.bf16.vlgmr.msrb.gmra.mxu3 %v1014_v12 }
 0x23a   : > { %1246 = vmatmul.bf16.vlgmr.msra.gmra.mxu0 %v1013_v11  ;;  %1259 = vmatmul.bf16.vlgmr.msra.gmra.mxu1 %v1014_v12  ;;  %v996_v13 = vpop.f32.mrf.mxu0  ;;  %v1009_v14 = vpop.f32.mrf.mxu1  ;;  %v2233_v11 = vld [vmem:[#allocation13 + $0xe4] sm:$0xf0]  ;;  %v2212_v12 = vld [vmem:[#allocation13 + $0x44] sm:$0xf] }
 0x23b   : > { %v2051_v13 = vld [vmem:[#allocation13 + $0x48] sm:$0xf0]  ;;  %v2130_v14 = vor.u32 %v2233_v11, %v2129_v9  ;;  %1525 = vmatpush.bf16.msra.mxu2 %v2050_v10  ;;  %v2223_v9 = vld [vmem:[#allocation13 + $0x94] sm:$0xf0]  ;;  %v2222_v10 = vld [vmem:[#allocation13 + $0x94] sm:$0xf] }
 0x23d   : > { %1536 = vmatpush.bf16.msra.mxu3 %v2130_v14 }
 0x2b7   : > { %v1247_v15 = vpop.f32.mrf.mxu0  ;;  %v1260_v17 = vpop.f32.mrf.mxu1 }
 0x2b8   : > { %v1248_v30 = vadd.f32 %v1247_v15, %v1049_v24  ;;  %v2054_v15 = vor.u32 %v2212_v12, %v2051_v13  ;;  %v2121_v24 = vld [vmem:[#allocation13 + $0xd0] sm:$0xf]  ;;  %v2091_v12 = vld [vmem:[#allocation13 + $0x98] sm:$0xf0]  ;;  %v2090_v13 = vor.u32 %v2223_v9, %v2089_v8 }
 0x2b9   : > { %v2094_v14 = vor.u32 %v2222_v10, %v2091_v12 }
 0x2ba   : > { %v1261_v28 = vadd.f32 %v1260_v17, %v1248_v30  ;;  %v2232_v17 = vld [vmem:[#allocation13 + $0xe4] sm:$0xf]  ;;  %1551 = vmatpush.bf16.msrb.mxu0 %v2054_v15  ;;  %v2081_v15 = vld [vmem:[#allocation13 + $0x80] sm:$0xf] }
 0x2bc   : > { %v1221_v20 = vpop.f32.mrf.mxu2  ;;  %v1234_v23 = vpop.f32.mrf.mxu3  ;;  %v1265_v35 = vmax.f32 %v1261_v28, 0.0 }
 0x2bd   : > { %v1222_v25 = vadd.f32 %v1221_v20, %v1048_v19  ;;  %v2134_v19 = vor.u32 %v2232_v17, %v2131_v18  ;;  %v2041_v20 = vld [vmem:[#allocation13 + $0x30] sm:$0xf]  ;;  %v2221_v17 = vld [vmem:[#allocation13 + $0x84] sm:$0xf0]  ;;  %v2220_v18 = vld [vmem:[#allocation13 + $0x84] sm:$0xf] }
 0x2bf   : > { %v1235_v26 = vadd.f32 %v1234_v23, %v1222_v25  ;;  %v1249_v22 = vpop.f32.mrf.mxu0  ;;  %v1262_v29 = vpop.f32.mrf.mxu1  ;;  %v2211_v23 = vld [vmem:[#allocation13 + $0x34] sm:$0xf0]  ;;  %1562 = vmatpush.bf16.msrb.mxu1 %v2134_v19  ;;  %v2083_v19 = vld [vmem:[#allocation13 + $0x88] sm:$0xf0] }
 0x2c0   : > { %v2042_v25 = vor.u32 %v2211_v23, %v2041_v20  ;;  %v2210_v22 = vld [vmem:[#allocation13 + $0x34] sm:$0xf]  ;;  %v2043_v29 = vld [vmem:[#allocation13 + $0x38] sm:$0xf0]  ;;  %v2082_v23 = vor.u32 %v2221_v17, %v2081_v15 }
 0x2c1   : > { %v1264_v31 = vmax.f32 %v1235_v26, 0.0  ;;  %v2231_v26 = vld [vmem:[#allocation13 + $0xd4] sm:$0xf0] }
 0x2c2   : > { %v2122_v30 = vor.u32 %v2231_v26, %v2121_v24  ;;  %1526 = vmatpush.bf16.msra.mxu2 %v2042_v25  ;;  %v2086_v25 = vor.u32 %v2220_v18, %v2083_v19 }
 0x2c3   : > { %1266 = vadd.xlane.f32.xlu1 %v1264_v31 }
 0x2c4   : > { %v1223_v32 = vpop.f32.mrf.mxu2  ;;  %v1236_v33 = vpop.f32.mrf.mxu3  ;;  %1537 = vmatpush.bf16.msra.mxu3 %v2122_v30 }
 0x2c5   : > { %v2230_v32 = vld [vmem:[#allocation13 + $0xd4] sm:$0xf]  ;;  %v2123_v33 = vld [vmem:[#allocation13 + $0xd8] sm:$0xf0] }
 0x2c6   : > { %v2126_v28 = vor.u32 %v2230_v32, %v2123_v33 }
 0x2c8   : > { %1563 = vmatpush.bf16.msrb.mxu1 %v2126_v28  ;;  %1538 = vmatpush.bf16.msra.mxu3 %v2114_v16 }
 0x2cb   : > { %1301 = vadd.xlane.f32.xlu1 %v1265_v35 }
 0x2cc   : > { %1564 = vmatpush.bf16.msrb.mxu1 %v2118_v37 }
 0x2d0   : > { %1565 = vmatpush.bf16.msrb.mxu1 %v2110_v51 }
 0x2d4   : > { %1566 = vmatpush.bf16.msrb.mxu1 %v2102_v7 }
 0x2d8   : > { %1567 = vmatpush.bf16.msrb.mxu1 %v2094_v14 }
 0x2dc   : > { %1568 = vmatpush.bf16.msrb.mxu1 %v2086_v25 }
 0x336   : > { %v1267_v40 = vpop.xlane.xlu1 %1266 }
 0x337   : > { %v1275_v52 = vmul.f32 %v3028_v39, %v1267_v40  ;;  %v2207_v40 = vld [vmem:[#allocation13 + $0x14] sm:$0xf0] }
 0x339   : > { %v3031_v41 = vsub.f32 %v1264_v31, %v1275_v52  ;;  %v2046_v31 = vor.u32 %v2210_v22, %v2043_v29  ;;  %v2105_v52 = vld [vmem:[#allocation13 + $0xb0] sm:$0xf] }
 0x33b   : > { %v1277_v42 = vmul.f32 %v3031_v41, %v3031_v41  ;;  %1552 = vmatpush.bf16.msrb.mxu0 %v2046_v31 }
 0x33d   : > { %1278 = vadd.xlane.f32.xlu2 %v1277_v42  ;;  %v2026_v42 = vor.u32 %v2207_v40, %v2025_v38 }
 0x33e   : > { %v1302_v43 = vpop.xlane.xlu1 %1301 }
 0x33f   : > { %v1303_v44 = vmul.f32 %v1302_v43, %v3028_v39  ;;  %1553 = vmatpush.bf16.msrb.mxu0 %v2038_v61  ;;  %v2227_v43 = vld [vmem:[#allocation13 + $0xb4] sm:$0xf0] }
 0x340   : > { %v2106_v47 = vor.u32 %v2227_v43, %v2105_v52 }
 0x341   : > { %v3036_v45 = vsub.f32 %v1265_v35, %v1303_v44  ;;  %v2033_v35 = vld [vmem:[#allocation13 + $0x20] sm:$0xf]  ;;  %v2206_v44 = vld [vmem:[#allocation13 + $0x14] sm:$0xf] }
 0x342   : > { %v2034_v34 = vor.u32 %v2209_v55, %v2033_v35  ;;  %1539 = vmatpush.bf16.msra.mxu3 %v2106_v47  ;;  %v2345_v55 = vld [vmem:[#allocation10] ss:$0 sm:$0xff] }
 0x343   : > { %v1305_v46 = vmul.f32 %v3036_v45, %v3036_v45 }
 0x344   : > { %1527 = vmatpush.bf16.msra.mxu2 %v2034_v34 }
 0x345   : > { %1306 = vadd.xlane.f32.xlu2 %v1305_v46  ;;  %v2027_v46 = vld [vmem:[#allocation13 + $0x18] sm:$0xf0] }
 0x346   : > { %v2030_v48 = vor.u32 %v2206_v44, %v2027_v46  ;;  %1540 = vmatpush.bf16.msra.mxu3 %v2098_v2 }
 0x348   : > { %1528 = vmatpush.bf16.msra.mxu2 %v2026_v42  ;;  %1554 = vmatpush.bf16.msrb.mxu0 %v2030_v48  ;;  %v841_v42 = vld [vmem:[%s3092_s9] sm:$0x3] }
 0x349   : > { %v1359_v44 = vperm.slane %v841_v42, 1  ;;  %v1358_v49 = vperm.slane %v841_v42, 0 }
 0x34a   : > { %1541 = vmatpush.bf16.msra.mxu3 %v2090_v13 }
 0x34c   : > { %1529 = vmatpush.bf16.msra.mxu2 %v2018_v58  ;;  %1555 = vmatpush.bf16.msrb.mxu0 %v2022_v3 }
 0x34e   : > { %1542 = vmatpush.bf16.msra.mxu3 %v2082_v23 }
 0x3b0   : > { %v1279_v57 = vpop.xlane.xlu2 %1278 }
 0x3b1   : > { %v1280_v1 = vmul.f32 %v1279_v57, %v3028_v39 }
 0x3b3   : > { %v1281_v11 = vadd.f32 1e-05, %v1280_v1 }
 0x3b5   : > { %2353 = vrsqrt.f32 %v1281_v11  ;;  %vm1288_vm14 = vweird.f32 %v1281_v11 }
 0x3b8   : > { %v1307_v20 = vpop.xlane.xlu2 %1306 }
 0x3b9   : > { %v1308_v24 = vmul.f32 %v1307_v20, %v3028_v39 }
 0x3bb   : > { %v2354_v26 = vpop.eup %2353  ;;  %v1309_v22 = vadd.f32 1e-05, %v1308_v24 }
 0x3bc   : > { %v1283_v29 = vmul.f32 %v2354_v26, %v1281_v11  ;;  %vm1289_vm13 = vweird.f32 %v2354_v26 }
 0x3bd   : > { %2355 = vrsqrt.f32 %v1309_v22  ;;  %vm1290_vm15 = vmor %vm1288_vm14, %vm1289_vm13  ;;  %vm1316_vm1 = vweird.f32 %v1309_v22 }
 0x3be   : > { %v1284_v30 = vmul.f32 %v2354_v26, %v1283_v29 }
 0x3c0   : > { %v1285_v31 = vmul.f32 0.5, %v1284_v30 }
 0x3c2   : > { %v1286_v32 = vsub.f32 1.5, %v1285_v31 }
 0x3c3   : > { %v2356_v33 = vpop.eup %2355 }
 0x3c4   : > { %v1287_v28 = vmul.f32 %v2354_v26, %v1286_v32  ;;  %v1311_v35 = vmul.f32 %v2356_v33, %v1309_v22  ;;  %vm1317_vm0 = vweird.f32 %v2356_v33 }
 0x3c5   : > { %vm1318_vm2 = vmor %vm1316_vm1, %vm1317_vm0 }
 0x3c6   : > { %v1291_v59 = vsel %vm1290_vm15, %v2354_v26, %v1287_v28  ;;  %v1312_v39 = vmul.f32 %v2356_v33, %v1311_v35 }
 0x3c7   : > { %v1292_v34 = vmul.f32 %v1291_v59, %v3031_v41 }
 0x3c8   : > { %v1313_v5 = vmul.f32 0.5, %v1312_v39 }
 0x3c9   : > { %v1296_v27 = vmul.f32 %v2345_v55, %v1292_v34 }
 0x3ca   : > { %v1314_v16 = vsub.f32 1.5, %v1313_v5 }
 0x3cb   : > { %v1300_v61 = vadd.f32 %v2346_v63, %v1296_v27 }
 0x3cc   : > { %v1315_v21 = vmul.f32 %v2356_v33, %v1314_v16 }
 0x3cd   : > { %v1323_v36 = vpack.c.bf16 %v1300_v61, %v1300_v61 }
 0x3ce   : > { %v1319_v37 = vsel %vm1318_vm2, %v2356_v33, %v1315_v21 }
 0x3cf   : > { %v1320_v38 = vmul.f32 %v1319_v37, %v3036_v45  ;;  %1530 = vmatmul.bf16.vlgmr.msra.gmra.mxu2 %v1323_v36  ;;  %1556 = vmatmul.bf16.vlgmr.msrb.gmra.mxu0 %v1323_v36 }
 0x3d1   : > { %v1321_v40 = vmul.f32 %v2345_v55, %v1320_v38 }
 0x3d3   : > { %v1322_v52 = vadd.f32 %v2346_v63, %v1321_v40 }
 0x3d5   : > { %v1324_v41 = vpack.c.bf16 %v1322_v52, %v1322_v52 }
 0x3d7   : > { %1543 = vmatmul.bf16.vlgmr.msra.gmra.mxu3 %v1324_v41  ;;  %1569 = vmatmul.bf16.vlgmr.msrb.gmra.mxu1 %v1324_v41 }
 0x44c   : > { %v1557_v43 = vpop.f32.mrf.mxu0 }
 0x44d   : > { %v1558_v47 = vadd.f32 %v1557_v43, %v1359_v44 }
 0x452   : > { %v1531_v46 = vpop.f32.mrf.mxu2 }
 0x453   : > { %v1532_v51 = vadd.f32 %v1531_v46, %v1358_v49 }
 0x454   : > { %v1559_v45 = vpop.f32.mrf.mxu0  ;;  %v1570_v48 = vpop.f32.mrf.mxu1 }
 0x455   : > { %v1571_v50 = vadd.f32 %v1570_v48, %v1558_v47 }
 0x457   : > { %1599 = vst [vmem:[%s3019_s26 + $0x10] sm:$0xff] %v1571_v50 }
 0x45a   : > { %v1533_v53 = vpop.f32.mrf.mxu2  ;;  %v1544_v54 = vpop.f32.mrf.mxu3 }
 0x45b   : > { %v1545_v56 = vadd.f32 %v1544_v54, %v1532_v51 }
 0x45c   : > { %v1572_v57 = vpop.f32.mrf.mxu1 }
 0x45d   : > { %1598 = vst [vmem:[%s3019_s26 + $0x8] sm:$0xff] %v1545_v56 }
 0x45e   : > { %2594 = shalt.err (!%p2591_p8)
}
 0x45f   : > { %2262 = dma.vmem_to_hbm [thread:$0]  (%p2806_p0), %s1615_s22, 384, %s1617_s15, %s1601_s20  }
 0x462   : > { %v1546_v58 = vpop.f32.mrf.mxu3 }
 0x463 PF: > { %s1628_s26 = sand.u32 1, %s2637_s13   ;;  %p3122_p10 = scmp.ge.s32.totalorder %s2649_s16, 2 }
 0x464   : > { %s1629_s19 = scalar_lea.sflag [#allocation4], %s1628_s26 }
 0x465   : > { %p2288_p11 = pnand %p3122_p10, %p2814_p6 }
 0x467   : > { %p2289_p12 = pneg %p2288_p11 }
 0x469   : > { %2632 = dma.done.wait (%p2289_p12), %s1629_s19, 384  }
 0x46a   : > { %2634 = vsyncadd (%p2289_p12), %s1629_s19, 4294966912  ;;  %s3123_s16 = sld [smem:[#allocation22_spill]]  ;;  %s3126_s13 = smov %s2641_s14 }
 0x46b   : > { %s3124_s11 = sld [smem:[#allocation21_spill]] }
 0x46c   : > { %s3125_s15 = sld [smem:[#allocation23_spill]] }
 0x470   : > { %p28_p2 = scmp.ge.s32.totalorder %s3123_s16, 4  }
 0x471   : > { %s3127_s14 = smov %s3124_s11 }
 0x472   :  { %30 = sbr.rel (!%p28_p2) target bundleno = 16 (0x10), region = 138 }
 0x477   :  { %1635 = vsyncpa [#allocation3], 1 }
 0x478   :  { %1637 = vsyncpa [#allocation3 + $0x1], 1 }
 0x479   :  { %1638 = vsyncpa [#allocation6], 1 }
 0x47a   :  { %1640 = vsyncpa [#allocation6 + $0x1], 1 }
 0x47b   :  { %1641 = vsyncpa [#allocation9], 1 }
 0x47c   :  { %1642 = vsyncpa [#allocation12], 1 }
 0x47d   :  { %1643 = vsyncpa [#allocation4], 1 }
 0x47e   :  { %1645 = vsyncpa [#allocation4 + $0x1], 1 }

</bundles_post_ra>
